<compile_context>
chip_gen: v5e
topology: v5e:2x2
jax: 0.10.0
libtpu: 0.0.40
codegen_flags: <defaults>
</compile_context>

<pallas_src>
import math

import jax
import jax.numpy as jnp
from jax.experimental import pallas as pl
from jax.experimental.pallas import tpu as pltpu

LANES = 128


def conv_relu_pool_kernel(x_ref, w_ref, b_ref, o_ref, m_scr):
    """Fused 3x3 conv + 2x2/2 max-pool + bias + ReLU for one batch element.

    x_ref : (1, H+2, W+2, Cin)   zero-padded NHWC input tile (input dtype)
    w_ref : (9*Cin, Cp)          bf16 conv weights, row = (kh*3 + kw)*Cin + c
    b_ref : (1, Cp)              f32 bias (zero in padded channels)
    o_ref : (1, H//2, W//2, Cp)
    m_scr : VMEM (H//2, W, Cp)   f32 row-pooled intermediate (for column pool)
    """
    _, Hp, Wp, Cin = x_ref.shape
    H, W = Hp - 2, Wp - 2
    Ho, Wo = H // 2, W // 2
    Cp = o_ref.shape[-1]

    # Single cast to the MXU operand dtype, then 9 shifted views.
    x = x_ref[0].astype(w_ref.dtype)                       # (H+2, W+2, Cin) bf16

    # im2col: 9 shifted views lane-concatenated -> (H*W, 9*Cin), tap = kh*3+kw.
    taps = [x[kh:kh + H, kw:kw + W, :].reshape(H * W, Cin)
            for kh in range(3) for kw in range(3)]
    patch = jnp.concatenate(taps, axis=-1)                 # (H*W, 9*Cin)

    # Single fused MXU matmul: (H*W, 9*Cin) @ (9*Cin, Cp), f32 accumulation.
    acc = jnp.dot(patch, w_ref[...], preferred_element_type=jnp.float32)

    # Row pool (stride-2 over H) on values: split H -> (Ho, 2, W, Cp).
    y = acc.reshape(Ho, 2, W, Cp)
    m_scr[...] = jnp.maximum(y[:, 0], y[:, 1])             # (Ho, W, Cp)

    # Column pool (stride-2 over W, the sublane axis) via strided ref reads.
    pooled = jnp.maximum(m_scr[:, pl.ds(0, Wo, stride=2), :],
                         m_scr[:, pl.ds(1, Wo, stride=2), :])

    # Bias + ReLU after pooling (4x fewer elements); exact — see header note.
    o_ref[0] = jnp.maximum(pooled + b_ref[...], 0.0).astype(o_ref.dtype)


def conv_relu_pool(x_nchw, weight, bias):
    """x_nchw: (N, Cin, H, W); weight: (Cout, Cin, 3, 3); bias: (Cout,)."""
    N, Cin, H, W = x_nchw.shape
    Cout = weight.shape[0]
    assert H % 2 == 0 and W % 2 == 0
    Ho, Wo = H // 2, W // 2
    Cp = ((Cout + LANES - 1) // LANES) * LANES             # lane-dense Cout
    K = 9 * Cin

    # Interface glue (NCHW -> padded NHWC).
    x_nhwc = jnp.transpose(x_nchw, (0, 2, 3, 1))
    x_pad = jnp.pad(x_nhwc, ((0, 0), (1, 1), (1, 1), (0, 0)))

    # (Cout,Cin,3,3) -> (kh,kw,Cin,Cout) -> (9*Cin, Cout) -> pad Cout -> bf16.
    w_mat = jnp.transpose(weight, (2, 3, 1, 0)).reshape(K, Cout)
    w_mat = jnp.pad(w_mat, ((0, 0), (0, Cp - Cout))).astype(jnp.bfloat16)
    b2d = jnp.pad(bias.reshape(1, Cout), ((0, 0), (0, Cp - Cout))).astype(jnp.float32)

    itemsize = jnp.dtype(x_nchw.dtype).itemsize
    flops = 2 * N * H * W * K * Cout
    bytes_accessed = int(x_pad.size * itemsize + w_mat.size * 2 + b2d.size * 4
                         + N * Ho * Wo * Cp * itemsize)

    # VMEM budget: double-buffered in/out blocks + weights/bias + f32 scratch,
    # with generous slack; clamped so it is valid on v5e/v6e/v7x alike.
    block_bytes = ((H + 2) * (W + 2) * Cin * itemsize      # input block
                   + Ho * Wo * Cp * itemsize)              # output block
    vmem_limit = int(min(64 * 1024 * 1024,
                         max(8 * 1024 * 1024,
                             4 * (2 * block_bytes + K * Cp * 2 + Cp * 4
                                  + Ho * W * Cp * 4))))

    out_nhwc = pl.pallas_call(
        conv_relu_pool_kernel,
        out_shape=jax.ShapeDtypeStruct((N, Ho, Wo, Cp), x_nchw.dtype),
        grid_spec=pltpu.PrefetchScalarGridSpec(
            num_scalar_prefetch=0,
            grid=(N,),
            in_specs=[
                pl.BlockSpec((1, H + 2, W + 2, Cin), lambda n: (n, 0, 0, 0)),
                pl.BlockSpec((K, Cp), lambda n: (0, 0)),
                pl.BlockSpec((1, Cp), lambda n: (0, 0)),
            ],
            out_specs=pl.BlockSpec((1, Ho, Wo, Cp), lambda n: (n, 0, 0, 0)),
            scratch_shapes=[pltpu.VMEM((Ho, W, Cp), jnp.float32)],
        ),
        compiler_params=pltpu.CompilerParams(
            dimension_semantics=("parallel",),
            vmem_limit_bytes=vmem_limit),
        cost_estimate=pl.CostEstimate(flops=flops, transcendentals=0,
                                      bytes_accessed=bytes_accessed),
    )(x_pad, w_mat, b2d)

    out_nhwc = out_nhwc[..., :Cout]          # drop lane padding BEFORE transpose
    return jnp.transpose(out_nhwc, (0, 3, 1, 2))            # back to NCHW


def reference(x_nchw, weight, bias):
    """Pure-JAX reference mirroring the PyTorch module (f32)."""
    y = jax.lax.conv_general_dilated(
        x_nchw, weight, window_strides=(1, 1), padding=((1, 1), (1, 1)),
        dimension_numbers=("NCHW", "OIHW", "NCHW"))
    y = y + bias[None, :, None, None]
    y = jnp.maximum(y, 0.0)
    N, C, H, W = y.shape
    return y.reshape(N, C, H // 2, 2, W // 2, 2).max(axis=(3, 5))


if __name__ == "__main__":
    N, Cin, Cout, H, W = 2, 4, 8, 16, 16

    key = jax.random.PRNGKey(0)
    k_w, k_b, k_x = jax.random.split(key, 3)

    # Deterministic init, same distribution as nn.Conv2d default (U(-k, k)).
    bound = 1.0 / math.sqrt(Cin * 3 * 3)
    weight = jax.random.uniform(k_w, (Cout, Cin, 3, 3), jnp.float32,
                                minval=-bound, maxval=bound)
    bias = jax.random.uniform(k_b, (Cout,), jnp.float32,
                              minval=-bound, maxval=bound)
    x = jax.random.normal(k_x, (N, Cin, H, W), jnp.float32)

    out = jax.block_until_ready(conv_relu_pool(x, weight, bias))

    ref = reference(x, weight, bias)
    assert out.shape == (N, Cout, H // 2, W // 2), out.shape
    assert jnp.allclose(out, ref, atol=2e-2, rtol=2e-2), (
        float(jnp.max(jnp.abs(out - ref))))

    print("KERNEL_OK")
</pallas_src>

<mosaic_0001>
module attributes {stable_mosaic.version = 11 : i64} {
  func.func @conv_relu_pool_kernel(%arg0: i32, %arg1: memref<1x18x18x4xf32, #tpu.memory_space<vmem>>, %arg2: memref<36x128xbf16, #tpu.memory_space<vmem>>, %arg3: memref<1x128xf32, #tpu.memory_space<vmem>>, %arg4: memref<1x8x8x128xf32, #tpu.memory_space<vmem>>, %arg5: memref<8x16x128xf32, #tpu.memory_space<vmem>>) attributes {dimension_semantics = [#tpu.dimension_semantics<parallel>], iteration_bounds = array<i64: 2>, scalar_prefetch = 0 : i64, scratch_operands = 1 : i64, tpu.core_type = #tpu.core_type<tc>, window_params = [{transform_indices = @transform_0, window_bounds = array<i64: 1, 18, 18, 4>}, {pipeline_mode = #tpu.pipeline_mode<synchronous>, transform_indices = @transform_1, window_bounds = array<i64: 36, 128>}, {pipeline_mode = #tpu.pipeline_mode<synchronous>, transform_indices = @transform_2, window_bounds = array<i64: 1, 128>}, {transform_indices = @transform_3, window_bounds = array<i64: 1, 8, 8, 128>}]} {
    %c0 = arith.constant 0 : index
    %c0_0 = arith.constant 0 : index
    %c0_1 = arith.constant 0 : index
    %c0_2 = arith.constant 0 : index
    %0 = vector.load %arg1[%c0, %c0_0, %c0_1, %c0_2] : memref<1x18x18x4xf32, #tpu.memory_space<vmem>>, vector<1x18x18x4xf32>
    %1 = vector.shape_cast %0 : vector<1x18x18x4xf32> to vector<18x18x4xf32>
    %2 = arith.truncf %1 : vector<18x18x4xf32> to vector<18x18x4xbf16>
    %3 = vector.extract_strided_slice %2 {offsets = [0, 0, 0], sizes = [16, 16, 4], strides = [1, 1, 1]} : vector<18x18x4xbf16> to vector<16x16x4xbf16>
    %4 = vector.shape_cast %3 : vector<16x16x4xbf16> to vector<256x4xbf16>
    %5 = vector.extract_strided_slice %2 {offsets = [0, 1, 0], sizes = [16, 16, 4], strides = [1, 1, 1]} : vector<18x18x4xbf16> to vector<16x16x4xbf16>
    %6 = vector.shape_cast %5 : vector<16x16x4xbf16> to vector<256x4xbf16>
    %7 = vector.extract_strided_slice %2 {offsets = [0, 2, 0], sizes = [16, 16, 4], strides = [1, 1, 1]} : vector<18x18x4xbf16> to vector<16x16x4xbf16>
    %8 = vector.shape_cast %7 : vector<16x16x4xbf16> to vector<256x4xbf16>
    %9 = vector.extract_strided_slice %2 {offsets = [1, 0, 0], sizes = [16, 16, 4], strides = [1, 1, 1]} : vector<18x18x4xbf16> to vector<16x16x4xbf16>
    %10 = vector.shape_cast %9 : vector<16x16x4xbf16> to vector<256x4xbf16>
    %11 = vector.extract_strided_slice %2 {offsets = [1, 1, 0], sizes = [16, 16, 4], strides = [1, 1, 1]} : vector<18x18x4xbf16> to vector<16x16x4xbf16>
    %12 = vector.shape_cast %11 : vector<16x16x4xbf16> to vector<256x4xbf16>
    %13 = vector.extract_strided_slice %2 {offsets = [1, 2, 0], sizes = [16, 16, 4], strides = [1, 1, 1]} : vector<18x18x4xbf16> to vector<16x16x4xbf16>
    %14 = vector.shape_cast %13 : vector<16x16x4xbf16> to vector<256x4xbf16>
    %15 = vector.extract_strided_slice %2 {offsets = [2, 0, 0], sizes = [16, 16, 4], strides = [1, 1, 1]} : vector<18x18x4xbf16> to vector<16x16x4xbf16>
    %16 = vector.shape_cast %15 : vector<16x16x4xbf16> to vector<256x4xbf16>
    %17 = vector.extract_strided_slice %2 {offsets = [2, 1, 0], sizes = [16, 16, 4], strides = [1, 1, 1]} : vector<18x18x4xbf16> to vector<16x16x4xbf16>
    %18 = vector.shape_cast %17 : vector<16x16x4xbf16> to vector<256x4xbf16>
    %19 = vector.extract_strided_slice %2 {offsets = [2, 2, 0], sizes = [16, 16, 4], strides = [1, 1, 1]} : vector<18x18x4xbf16> to vector<16x16x4xbf16>
    %20 = vector.shape_cast %19 : vector<16x16x4xbf16> to vector<256x4xbf16>
    %21 = tpu.concatenate %4, %6, %8, %10, %12, %14, %16, %18, %20 in 1 : vector<256x4xbf16>, vector<256x4xbf16>, vector<256x4xbf16>, vector<256x4xbf16>, vector<256x4xbf16>, vector<256x4xbf16>, vector<256x4xbf16>, vector<256x4xbf16>, vector<256x4xbf16> -> vector<256x36xbf16>
    %c0_3 = arith.constant 0 : index
    %c0_4 = arith.constant 0 : index
    %22 = vector.load %arg2[%c0_3, %c0_4] : memref<36x128xbf16, #tpu.memory_space<vmem>>, vector<36x128xbf16>
    %cst = arith.constant dense<0.000000e+00> : vector<256x128xf32>
    %23 = tpu.matmul %21, %22, %cst {dimension_numbers = #tpu.dot_dimension_numbers<[1], [0], [0], [1], [0, 0, 1, 1], [], []>} : vector<256x36xbf16>, vector<36x128xbf16>, vector<256x128xf32> -> vector<256x128xf32>
    %24 = vector.shape_cast %23 : vector<256x128xf32> to vector<8x2x16x128xf32>
    %25 = vector.extract_strided_slice %24 {offsets = [0, 0, 0, 0], sizes = [8, 1, 16, 128], strides = [1, 1, 1, 1]} : vector<8x2x16x128xf32> to vector<8x1x16x128xf32>
    %26 = vector.shape_cast %25 : vector<8x1x16x128xf32> to vector<8x16x128xf32>
    %27 = vector.extract_strided_slice %24 {offsets = [0, 1, 0, 0], sizes = [8, 1, 16, 128], strides = [1, 1, 1, 1]} : vector<8x2x16x128xf32> to vector<8x1x16x128xf32>
    %28 = vector.shape_cast %27 : vector<8x1x16x128xf32> to vector<8x16x128xf32>
    %29 = arith.maximumf %26, %28 : vector<8x16x128xf32>
    %c0_5 = arith.constant 0 : index
    %c0_6 = arith.constant 0 : index
    %c0_7 = arith.constant 0 : index
    %30 = vector.load %arg5[%c0_5, %c0_6, %c0_7] : memref<8x16x128xf32, #tpu.memory_space<vmem>>, vector<8x16x128xf32>
    tpu.vector_store %arg5[%c0_5, %c0_6, %c0_7], %29 {strides = array<i32>} : memref<8x16x128xf32, #tpu.memory_space<vmem>>, vector<8x16x128xf32>,
    %c0_8 = arith.constant 0 : index
    %c0_9 = arith.constant 0 : index
    %c0_10 = arith.constant 0 : index
    %31 = tpu.strided_load %arg5[%c0_8, %c0_9, %c0_10] {strides = array<i32: 1, 2, 1>} : memref<8x16x128xf32, #tpu.memory_space<vmem>>, vector<8x8x128xf32>
    %c0_11 = arith.constant 0 : index
    %c1 = arith.constant 1 : index
    %c0_12 = arith.constant 0 : index
    %32 = tpu.strided_load %arg5[%c0_11, %c1, %c0_12] {strides = array<i32: 1, 2, 1>} : memref<8x16x128xf32, #tpu.memory_space<vmem>>, vector<8x8x128xf32>
    %33 = arith.maximumf %31, %32 : vector<8x8x128xf32>
    %c0_13 = arith.constant 0 : index
    %c0_14 = arith.constant 0 : index
    %34 = vector.load %arg3[%c0_13, %c0_14] : memref<1x128xf32, #tpu.memory_space<vmem>>, vector<1x128xf32>
    %35 = vector.shape_cast %34 : vector<1x128xf32> to vector<1x1x128xf32>
    %36 = vector.broadcast %35 : vector<1x1x128xf32> to vector<8x8x128xf32>
    %37 = arith.addf %33, %36 : vector<8x8x128xf32>
    %cst_15 = arith.constant 0.000000e+00 : f32
    %38 = vector.broadcast %cst_15 : f32 to vector<8x8x128xf32>
    %39 = arith.maximumf %37, %38 : vector<8x8x128xf32>
    %c0_16 = arith.constant 0 : index
    %c0_17 = arith.constant 0 : index
    %c0_18 = arith.constant 0 : index
    %c0_19 = arith.constant 0 : index
    %40 = vector.load %arg4[%c0_16, %c0_17, %c0_18, %c0_19] : memref<1x8x8x128xf32, #tpu.memory_space<vmem>>, vector<1x8x8x128xf32>
    %41 = vector.shape_cast %40 : vector<1x8x8x128xf32> to vector<8x8x128xf32>
    %42 = vector.shape_cast %39 : vector<8x8x128xf32> to vector<1x8x8x128xf32>
    tpu.vector_store %arg4[%c0_16, %c0_17, %c0_18, %c0_19], %42 {strides = array<i32>} : memref<1x8x8x128xf32, #tpu.memory_space<vmem>>, vector<1x8x8x128xf32>,
    return
  }
  func.func @transform_0(%arg0: i32) -> (i32, i32, i32, i32) {
    %c0_i32 = arith.constant 0 : i32
    %c0_i32_0 = arith.constant 0 : i32
    %c0_i32_1 = arith.constant 0 : i32
    %c0_i32_2 = arith.constant 0 : i32
    return %arg0, %c0_i32, %c0_i32_0, %c0_i32_1 : i32, i32, i32, i32
  }
  func.func @transform_1(%arg0: i32) -> (i32, i32) {
    %c0_i32 = arith.constant 0 : i32
    %c0_i32_0 = arith.constant 0 : i32
    %c0_i32_1 = arith.constant 0 : i32
    return %c0_i32, %c0_i32_0 : i32, i32
  }
  func.func @transform_2(%arg0: i32) -> (i32, i32) {
    %c0_i32 = arith.constant 0 : i32
    %c0_i32_0 = arith.constant 0 : i32
    %c0_i32_1 = arith.constant 0 : i32
    return %c0_i32, %c0_i32_0 : i32, i32
  }
  func.func @transform_3(%arg0: i32) -> (i32, i32, i32, i32) {
    %c0_i32 = arith.constant 0 : i32
    %c0_i32_0 = arith.constant 0 : i32
    %c0_i32_1 = arith.constant 0 : i32
    %c0_i32_2 = arith.constant 0 : i32
    return %arg0, %c0_i32, %c0_i32_0, %c0_i32_1 : i32, i32, i32, i32
  }
}

</mosaic_0001>

<bundles_post_ra>
// kernel: tpu_custom_call.1
= control target key start
LH: loop header
LB: loop body
LE: loop exit
PB: predicated region body
PF: predicated region fallthrough
CT: control target
= control target key end

     0   :  { %8 = vsyncpa [#allocation4], 0  ;;  %s3356_s0 = inlined_call_operand.vmem [shape: f32[2,18,18,4], index: 0, kind: input, shape index: {}]   ;;  %s3357_s1 = inlined_call_operand.vmem [shape: bf16[36,128], index: 1, kind: input, shape index: {}]   ;;  %s3358_s2 = inlined_call_operand.vmem [shape: f32[1,128], index: 2, kind: input, shape index: {}]   ;;  %s3359_s3 = inlined_call_operand.hbm [shape: f32[2,8,8,128], index: 3, kind: output, shape index: {}]  }
   0x1   :  { %10 = vsyncpa [#allocation4 + $0x1], 0  ;;  %s2125_s12 = smov 0   ;;  %s2127_s13 = smov 0  }
   0x2   :  { %s2129_s14 = smov 0   ;;  %s2131_s15 = smov 0  }
   0x3 LB: > { %s2146_s16 = sadd.s32 4294967295, %s2094_s15   ;;  %s1917_s17 = sadd.s32 4294967294, %s2094_s15   ;;  %s2094_s15 = sphi %s2131_s15, %s3447_s15   ;;  %s2090_s14 = sphi %s2129_s14, %s3446_s14   ;;  %s2086_s13 = sphi %s2127_s13, %s3445_s13   ;;  %s2082_s12 = sphi %s2125_s12, %s3444_s12  }
   0x4   : > { %s2150_s18 = sadd.s32 1, %s2094_s15   ;;  %s91_s19 = sadd.s32 1, %s2090_s14 }
   0x5   : > { %s88_s20 = ssub.s32 %s2094_s15, %s2150_s18  ;;  %p101_p0 = scmp.ne.s32.totalorder %s2090_s14, %s2086_s13 }
   0x6   : > { %p89_p1 = scmp.eq.s32.totalorder %s88_s20, 0  ;;  %p102_p2 = scmp.eq.s32.totalorder %s2146_s16, 1 }
   0x7   : > { %p107_p3 = scmp.ne.s32.totalorder %s2086_s13, %s2082_s12  ;;  %p108_p4 = scmp.eq.s32.totalorder %s1917_s17, 1 }
   0x8   : > { %s2161_s21 = scalar_select %p89_p1, %s2090_s14, %s91_s19  }
   0x9   : > { %p2163_p5 = por %p102_p2, %p101_p0  ;;  %p2167_p6 = por %p108_p4, %p107_p3 }
   0xa   : > { %p1920_p7 = scmp.ge.s32.totalorder %s2094_s15, 1  ;;  %p140_p8 = scmp.lt.s32.totalorder %s2094_s15, 3 }
   0xc   : > { %p141_p9 = pnand %p1920_p7, %p140_p8 }
   0xe   : > { %144 = sbr.rel (%p141_p9) target bundleno = 695 (0x2b7), region = 32 }
  0x13   : > { %p164_p10 = scmp.lt.s32.totalorder %s2146_s16, 1  ;;  %vm278_vm0 = vsmask.f32 3328  ;;  %vm279_vm1 = vsmask.f32 7440  ;;  %s2096_s29 = smov 4  }
  0x14   : > { %vm2213_vm2 = vmor %vm278_vm0, %vm279_vm1  ;;  %vm713_vm3 = vcmask 1042432   ;;  %vm714_vm4 = vcmask 1046532   ;;  %s2097_s30 = smov 8   ;;  %s2098_s4 = smov 12   ;;  %vm1314_vm6 = vcmask 31744   ;;  %vm1363_vm7 = vcmask 64512  }
  0x15   : > { %s165_s24 = scalar_select %p164_p10, %s2146_s16, 1  ;;  %vm2502_vm5 = vmor %vm713_vm3, %vm714_vm4  ;;  %vm1396_vm8 = vcmask 97280   ;;  %vm1647_vm9 = vcmask 1041408   ;;  %vm1429_vm10 = vcmask 130048   ;;  %vm1462_vm11 = vcmask 162816  }
  0x16   : > { %s2099_s5 = smov 20   ;;  %s2100_s6 = smov 16   ;;  %vm1495_vm12 = vcmask 195584   ;;  %vm1528_vm13 = vcmask 228352   ;;  %vm1561_vm14 = vcmask 261120   ;;  %vm1614_vm15 = vcmask 293888  }
  0x17   : > { %s1982_s25 = smul.u32 432, %s165_s24  ;;  %s2101_s7 = smov 24  }
  0x18   : > { %s2102_s8 = smov 32   ;;  %s2103_s9 = smov 28  }
  0x19   : > { %s2178_s28 = scalar_lea.vmem %s3356_s0, %s1982_s25  ;;  %s161_s25 = sand.u32 1, %s2086_s13  }
  0x1a   : > { %v182_v0 = vld [vmem:[%s2178_s28 + $0x60] sm:$0xff]  ;;  %v183_v1 = vld [vmem:[%s2178_s28 + $0x68] sm:$0xff]  ;;  %v184_v2 = vld [vmem:[%s2178_s28 + $0x70] sm:$0x3]  ;;  %s2052_s20 = scalar_lea.hbm %s3359_s3, 128 }
  0x1b   : > { %v2183_v3 = vpack.c.bf16 %v182_v0, %v182_v0  ;;  %v2185_v4 = vpack.c.bf16 %v183_v1, %v183_v1  ;;  %v2187_v5 = vpack.c.bf16 %v184_v2, %v184_v2  ;;  %v176_v6 = vld [vmem:[%s2178_s28 + $0x30] sm:$0xff]  ;;  %v177_v7 = vld [vmem:[%s2178_s28 + $0x38] sm:$0xff]  ;;  %v178_v8 = vld [vmem:[%s2178_s28 + $0x40] sm:$0x3] }
  0x1c   : > { %v2192_v9 = vpack.c.bf16 %v176_v6, %v176_v6  ;;  %v2194_v10 = vpack.c.bf16 %v177_v7, %v177_v7  ;;  %v2196_v11 = vpack.c.bf16 %v178_v8, %v178_v8  ;;  %v170_v20 = vld [vmem:[%s2178_s28] sm:$0xff]  ;;  %v171_v21 = vld [vmem:[%s2178_s28 + $0x8] sm:$0xff]  ;;  %v172_v26 = vld [vmem:[%s2178_s28 + $0x10] sm:$0x3] }
  0x1d   : > { %v378_v12 = vshrl.u32 %v2183_v3, 16  ;;  %v381_v13 = vshll.u32 %v2183_v3, 16  ;;  %v387_v14 = vshll.u32 %v2185_v4, 16  ;;  %v391_v15 = vshrl.u32 %v2185_v4, 16  ;;  %v185_v52 = vld [vmem:[%s2178_s28 + $0x78] sm:$0xff]  ;;  %v186_v57 = vld [vmem:[%s2178_s28 + $0x80] sm:$0xff] }
  0x1e   : > { %v397_v16 = vshll.u32 %v2187_v5, 16  ;;  %v330_v17 = vshrl.u32 %v2192_v9, 16  ;;  %v333_v18 = vshll.u32 %v2192_v9, 16  ;;  %v339_v19 = vshll.u32 %v2194_v10, 16  ;;  %v187_v58 = vld [vmem:[%s2178_s28 + $0x88] sm:$0x3] }
  0x1f   : > { %v380_v22 = vrot.slane %v378_v12, 4  ;;  %v383_v23 = vrot.slane %v381_v13, 5  ;;  %v389_v24 = vrot.slane %v387_v14, 5  ;;  %v393_v25 = vrot.slane %v391_v15, 4 }
  0x20   : > { %v399_v27 = vrot.slane %v397_v16, 5  ;;  %v332_v28 = vrot.slane %v330_v17, 4  ;;  %v335_v29 = vrot.slane %v333_v18, 5  ;;  %v341_v30 = vrot.slane %v339_v19, 5 }
  0x21   : > { %v384_v31 = vor.u32 %v383_v23, %v380_v22  ;;  %v394_v32 = vor.u32 %v393_v25, %v389_v24  ;;  %v343_v33 = vshrl.u32 %v2194_v10, 16  ;;  %v349_v34 = vshll.u32 %v2196_v11, 16 }
  0x22   : > { %v336_v36 = vor.u32 %v335_v29, %v332_v28  ;;  %v2217_v37 = vpack.c.bf16 %v170_v20, %v170_v20  ;;  %v2219_v38 = vpack.c.bf16 %v171_v21, %v171_v21  ;;  %v2221_v39 = vpack.c.bf16 %v172_v26, %v172_v26  ;;  %v179_v21 = vld [vmem:[%s2178_s28 + $0x48] sm:$0xff]  ;;  %v180_v26 = vld [vmem:[%s2178_s28 + $0x50] sm:$0xff] }
  0x23   : > { %v385_v40 = vrot.slane %v384_v31, 4  ;;  %v395_v41 = vrot.slane %v394_v32, 4  ;;  %v345_v42 = vrot.slane %v343_v33, 4  ;;  %v351_v43 = vrot.slane %v349_v34, 5  ;;  %v181_v31 = vld [vmem:[%s2178_s28 + $0x58] sm:$0x3] }
  0x24   : > { %3400 = vst [vmem:[#allocation6_spill] sm:$0xff] %v2217_v37  ;;  %v337_v44 = vrot.slane %v336_v36, 4  ;;  %v282_v45 = vshrl.u32 %v2217_v37, 16  ;;  %v285_v46 = vshll.u32 %v2217_v37, 16  ;;  %v291_v47 = vshll.u32 %v2219_v38, 16  ;;  %v173_v32 = vld [vmem:[%s2178_s28 + $0x18] sm:$0xff] }
  0x25   : > { %3401 = vst [vmem:[#allocation7_spill] sm:$0xff] %v2219_v38  ;;  %v390_v48 = vsel %vm2213_vm2, %v385_v40, %v389_v24  ;;  %v400_v49 = vsel %vm2213_vm2, %v395_v41, %v399_v27  ;;  %v346_v50 = vor.u32 %v345_v42, %v341_v30  ;;  %v295_v51 = vshrl.u32 %v2219_v38, 16 }
  0x26   : > { %v952_v53 = vunpack.c.l.b16 %v390_v48  ;;  %v953_v54 = vunpack.c.l.b16 %v400_v49  ;;  %v342_v55 = vsel %vm2213_vm2, %v337_v44, %v341_v30  ;;  %v284_v56 = vrot.slane %v282_v45, 4  ;;  %v174_v48 = vld [vmem:[%s2178_s28 + $0x20] sm:$0xff] }
  0x27   : > { %v347_v59 = vrot.slane %v346_v50, 4  ;;  %v948_v60 = vunpack.c.l.b16 %v342_v55  ;;  %v287_v61 = vrot.slane %v285_v46, 5  ;;  %v293_v62 = vrot.slane %v291_v47, 5 }
  0x28   : > { %v2236_v63 = vpack.c.b16 %v953_v54, %v952_v53  ;;  %v297_v0 = vrot.slane %v295_v51, 4  ;;  %v301_v1 = vshll.u32 %v2221_v39, 16  ;;  %v2239_v2 = vpack.c.bf16 %v185_v52, %v185_v52 }
  0x29   : > { %v352_v6 = vsel %vm2213_vm2, %v347_v59, %v351_v43  ;;  %v288_v7 = vor.u32 %v287_v61, %v284_v56  ;;  %v2243_v8 = vpack.c.bf16 %v186_v57, %v186_v57  ;;  %v2245_v12 = vpack.c.bf16 %v187_v58, %v187_v58  ;;  %v175_v58 = vld [vmem:[%s2178_s28 + $0x28] sm:$0x3] }
  0x2a   : > { %3402 = vst [vmem:[#allocation8_spill] sm:$0xff] %v2236_v63  ;;  %1000 = vrot.lane.b32.xlu2 %v2236_v63, %s2096_s29  ;;  %v949_v13 = vunpack.c.l.b16 %v352_v6  ;;  %v298_v14 = vor.u32 %v297_v0, %v293_v62  ;;  %v303_v15 = vrot.slane %v301_v1, 5  ;;  %v402_v16 = vshrl.u32 %v2239_v2, 16 }
  0x2b   : > { %v289_v17 = vrot.slane %v288_v7, 4  ;;  %v405_v18 = vshll.u32 %v2239_v2, 16  ;;  %v411_v19 = vshll.u32 %v2243_v8, 16  ;;  %v415_v20 = vshrl.u32 %v2243_v8, 16 }
  0x2c   : > { %v2254_v22 = vpack.c.b16 %v949_v13, %v948_v60  ;;  %v299_v23 = vrot.slane %v298_v14, 4  ;;  %v404_v24 = vrot.slane %v402_v16, 4  ;;  %v421_v25 = vshll.u32 %v2245_v12, 16 }
  0x2d   : > { %v294_v27 = vsel %vm2213_vm2, %v289_v17, %v293_v62  ;;  %v407_v28 = vrot.slane %v405_v18, 5  ;;  %v413_v29 = vrot.slane %v411_v19, 5  ;;  %v417_v30 = vrot.slane %v415_v20, 4  ;;  %v194_v17 = vld [vmem:[%s2178_s28 + $0xc0] sm:$0xff] }
  0x2e   : > { %3403 = vst [vmem:[#allocation9_spill] sm:$0xff] %v2254_v22  ;;  %996 = vrot.lane.b32.xlu1 %v2254_v22, %s2096_s29  ;;  %v304_v33 = vsel %vm2213_vm2, %v299_v23, %v303_v15  ;;  %v944_v34 = vunpack.c.l.b16 %v294_v27  ;;  %v423_v36 = vrot.slane %v421_v25, 5  ;;  %v2266_v40 = vpack.c.bf16 %v179_v21, %v179_v21  ;;  %v195_v23 = vld [vmem:[%s2178_s28 + $0xc8] sm:$0xff] }
  0x2f   : > { %v945_v41 = vunpack.c.l.b16 %v304_v33  ;;  %v408_v42 = vor.u32 %v407_v28, %v404_v24  ;;  %v418_v43 = vor.u32 %v417_v30, %v413_v29  ;;  %v2268_v44 = vpack.c.bf16 %v180_v26, %v180_v26  ;;  %v196_v28 = vld [vmem:[%s2178_s28 + $0xd0] sm:$0x3] }
  0x30   : > { %v2270_v45 = vpack.c.bf16 %v181_v31, %v181_v31  ;;  %v354_v46 = vshrl.u32 %v2266_v40, 16  ;;  %v357_v47 = vshll.u32 %v2266_v40, 16  ;;  %v2275_v49 = vpack.c.bf16 %v173_v32, %v173_v32 }
  0x31   : > { %v976_v50 = vpack.c.b16 %v945_v41, %v944_v34  ;;  %v409_v51 = vrot.slane %v408_v42, 4  ;;  %v419_v52 = vrot.slane %v418_v43, 4  ;;  %v363_v53 = vshll.u32 %v2268_v44, 16 }
  0x32   : > { %v356_v54 = vrot.slane %v354_v46, 4  ;;  %v359_v55 = vrot.slane %v357_v47, 5  ;;  %v367_v56 = vshrl.u32 %v2268_v44, 16  ;;  %v373_v57 = vshll.u32 %v2270_v45, 16 }
  0x33   : > { %992 = vrot.lane.b32.xlu0 %v976_v50, %s2096_s29  ;;  %v414_v59 = vsel %vm2213_vm2, %v409_v51, %v413_v29  ;;  %v424_v60 = vsel %vm2213_vm2, %v419_v52, %v423_v36  ;;  %v365_v61 = vrot.slane %v363_v53, 5  ;;  %v2286_v62 = vpack.c.bf16 %v174_v48, %v174_v48 }
  0x34   : > { %v954_v0 = vunpack.c.l.b16 %v414_v59  ;;  %v955_v1 = vunpack.c.l.b16 %v424_v60  ;;  %v360_v6 = vor.u32 %v359_v55, %v356_v54  ;;  %v369_v7 = vrot.slane %v367_v56, 4 }
  0x35   : > { %v375_v13 = vrot.slane %v373_v57, 5  ;;  %v2288_v14 = vpack.c.bf16 %v175_v58, %v175_v58  ;;  %v306_v15 = vshrl.u32 %v2275_v49, 16  ;;  %v309_v16 = vshll.u32 %v2275_v49, 16  ;;  %v191_v57 = vld [vmem:[%s2178_s28 + $0xa8] sm:$0xff]  ;;  %v192_v58 = vld [vmem:[%s2178_s28 + $0xb0] sm:$0xff] }
  0x36   : > { %v2293_v18 = vpack.c.b16 %v955_v1, %v954_v0  ;;  %v361_v19 = vrot.slane %v360_v6, 4  ;;  %v370_v20 = vor.u32 %v369_v7, %v365_v61  ;;  %v315_v21 = vshll.u32 %v2286_v62, 16  ;;  %v193_v1 = vld [vmem:[%s2178_s28 + $0xb8] sm:$0x3]  ;;  %v188_v6 = vld [vmem:[%s2178_s28 + $0x90] sm:$0xff] }
  0x37   : > { %v308_v24 = vrot.slane %v306_v15, 4  ;;  %v311_v25 = vrot.slane %v309_v16, 5  ;;  %v319_v26 = vshrl.u32 %v2286_v62, 16  ;;  %v325_v27 = vshll.u32 %v2288_v14, 16 }
  0x38   : > { %3404 = vst [vmem:[#allocation10_spill] sm:$0xff] %v2293_v18  ;;  %1002 = vrot.lane.b32.xlu2 %v2293_v18, %s2096_s29  ;;  %v366_v29 = vsel %vm2213_vm2, %v361_v19, %v365_v61  ;;  %v371_v30 = vrot.slane %v370_v20, 4  ;;  %v317_v31 = vrot.slane %v315_v21, 5  ;;  %v2304_v32 = vpack.c.bf16 %v194_v17, %v194_v17 }
  0x39   : > { %v950_v33 = vunpack.c.l.b16 %v366_v29  ;;  %v312_v34 = vor.u32 %v311_v25, %v308_v24  ;;  %v321_v36 = vrot.slane %v319_v26, 4  ;;  %v327_v41 = vrot.slane %v325_v27, 5 }
  0x3a   : > { %v376_v42 = vsel %vm2213_vm2, %v371_v30, %v375_v13  ;;  %v2308_v43 = vpack.c.bf16 %v195_v23, %v195_v23  ;;  %v2310_v46 = vpack.c.bf16 %v196_v28, %v196_v28  ;;  %v474_v47 = vshrl.u32 %v2304_v32, 16 }
  0x3b   : > { %v951_v48 = vunpack.c.l.b16 %v376_v42  ;;  %v313_v50 = vrot.slane %v312_v34, 4  ;;  %v322_v51 = vor.u32 %v321_v36, %v317_v31  ;;  %v477_v52 = vshll.u32 %v2304_v32, 16  ;;  %v190_v42 = vld [vmem:[%s2178_s28 + $0xa0] sm:$0x3] }
  0x3c   : > { %v476_v53 = vrot.slane %v474_v47, 4  ;;  %v483_v54 = vshll.u32 %v2308_v43, 16  ;;  %v487_v55 = vshrl.u32 %v2308_v43, 16  ;;  %v493_v56 = vshll.u32 %v2310_v46, 16 }
  0x3d   : > { %v2319_v59 = vpack.c.b16 %v951_v48, %v950_v33  ;;  %v318_v60 = vsel %vm2213_vm2, %v313_v50, %v317_v31  ;;  %v323_v61 = vrot.slane %v322_v51, 4  ;;  %v479_v0 = vrot.slane %v477_v52, 5  ;;  %v203_v52 = vld [vmem:[%s2178_s28 + $0x108] sm:$0xff] }
  0x3e   : > { %v946_v7 = vunpack.c.l.b16 %v318_v60  ;;  %v485_v13 = vrot.slane %v483_v54, 5  ;;  %v489_v15 = vrot.slane %v487_v55, 4  ;;  %v495_v16 = vrot.slane %v493_v56, 5 }
  0x3f   : > { %3405 = vst [vmem:[#allocation11_spill] sm:$0xff] %v2319_v59  ;;  %998 = vrot.lane.b32.xlu1 %v2319_v59, %s2096_s29  ;;  %v328_v17 = vsel %vm2213_vm2, %v323_v61, %v327_v41  ;;  %v480_v19 = vor.u32 %v479_v0, %v476_v53  ;;  %v2329_v20 = vpack.c.bf16 %v191_v57, %v191_v57  ;;  %v189_v41 = vld [vmem:[%s2178_s28 + $0x98] sm:$0xff] }
  0x40   : > { %v2331_v21 = vpack.c.bf16 %v192_v58, %v192_v58  ;;  %v947_v23 = vunpack.c.l.b16 %v328_v17  ;;  %v490_v24 = vor.u32 %v489_v15, %v485_v13  ;;  %v2333_v25 = vpack.c.bf16 %v193_v1, %v193_v1 }
  0x41   : > { %v2335_v26 = vpack.c.bf16 %v188_v6, %v188_v6  ;;  %v481_v27 = vrot.slane %v480_v19, 4  ;;  %v450_v28 = vshrl.u32 %v2329_v20, 16  ;;  %v453_v29 = vshll.u32 %v2329_v20, 16 }
  0x42   : > { %v459_v30 = vshll.u32 %v2331_v21, 16  ;;  %v2340_v31 = vpack.c.b16 %v947_v23, %v946_v7  ;;  %v491_v33 = vrot.slane %v490_v24, 4  ;;  %v463_v34 = vshrl.u32 %v2331_v21, 16  ;;  %v204_v7 = vld [vmem:[%s2178_s28 + $0x110] sm:$0xff] }
  0x43   : > { %v469_v36 = vshll.u32 %v2333_v25, 16  ;;  %v486_v47 = vsel %vm2213_vm2, %v481_v27, %v485_v13  ;;  %v452_v48 = vrot.slane %v450_v28, 4  ;;  %v455_v50 = vrot.slane %v453_v29, 5  ;;  %v205_v29 = vld [vmem:[%s2178_s28 + $0x118] sm:$0x3] }
  0x44   : > { %3406 = vst [vmem:[#allocation12_spill] sm:$0xff] %v2340_v31  ;;  %v461_v51 = vrot.slane %v459_v30, 5  ;;  %994 = vrot.lane.b32.xlu0 %v2340_v31, %s2096_s29  ;;  %v496_v53 = vsel %vm2213_vm2, %v491_v33, %v495_v16  ;;  %v960_v54 = vunpack.c.l.b16 %v486_v47  ;;  %v465_v55 = vrot.slane %v463_v34, 4 }
  0x45   : > { %v471_v56 = vrot.slane %v469_v36, 5  ;;  %v961_v57 = vunpack.c.l.b16 %v496_v53  ;;  %v456_v58 = vor.u32 %v455_v50, %v452_v48  ;;  %v2353_v60 = vpack.c.bf16 %v189_v41, %v189_v41 }
  0x46   : > { %v2355_v61 = vpack.c.bf16 %v190_v42, %v190_v42  ;;  %v466_v0 = vor.u32 %v465_v55, %v461_v51  ;;  %v426_v1 = vshrl.u32 %v2335_v26, 16  ;;  %v429_v6 = vshll.u32 %v2335_v26, 16 }
  0x47   : > { %v2360_v13 = vpack.c.bf16 %v203_v52, %v203_v52  ;;  %v2362_v15 = vpack.c.b16 %v961_v57, %v960_v54  ;;  %v457_v16 = vrot.slane %v456_v58, 4  ;;  %v435_v17 = vshll.u32 %v2353_v60, 16 }
  0x48   : > { %v439_v19 = vshrl.u32 %v2353_v60, 16  ;;  %v467_v23 = vrot.slane %v466_v0, 4  ;;  %v428_v24 = vrot.slane %v426_v1, 4  ;;  %v431_v27 = vrot.slane %v429_v6, 5 }
  0x49   : > { %3407 = vst [vmem:[#allocation13_spill] sm:$0xff] %v2360_v13  ;;  %v445_v28 = vshll.u32 %v2355_v61, 16  ;;  %1008 = vrot.lane.b32.xlu2 %v2362_v15, %s2096_s29  ;;  %v462_v30 = vsel %vm2213_vm2, %v457_v16, %v461_v51  ;;  %v437_v33 = vrot.slane %v435_v17, 5  ;;  %v2372_v36 = vpack.c.bf16 %v204_v7, %v204_v7  ;;  %v201_v16 = vld [vmem:[%s2178_s28 + $0xf8] sm:$0xff] }
  0x4a   : > { %3408 = vst [vmem:[#allocation14_spill] sm:$0xff] %v2362_v15  ;;  %v441_v34 = vrot.slane %v439_v19, 4  ;;  %v472_v41 = vsel %vm2213_vm2, %v467_v23, %v471_v56  ;;  %v958_v42 = vunpack.c.l.b16 %v462_v30  ;;  %v432_v47 = vor.u32 %v431_v27, %v428_v24  ;;  %v200_v56 = vld [vmem:[%s2178_s28 + $0xf0] sm:$0xff]  ;;  %v202_v27 = vld [vmem:[%s2178_s28 + $0x100] sm:$0x3] }
  0x4b   : > { %v447_v48 = vrot.slane %v445_v28, 5  ;;  %v959_v50 = vunpack.c.l.b16 %v472_v41  ;;  %v2376_v53 = vpack.c.bf16 %v205_v29, %v205_v29  ;;  %v546_v54 = vshrl.u32 %v2360_v13, 16  ;;  %v197_v28 = vld [vmem:[%s2178_s28 + $0xd8] sm:$0xff] }
  0x4c   : > { %v442_v52 = vor.u32 %v441_v34, %v437_v33  ;;  %v433_v51 = vrot.slane %v432_v47, 4  ;;  %v549_v55 = vshll.u32 %v2360_v13, 16  ;;  %v555_v57 = vshll.u32 %v2372_v36, 16 }
  0x4d   : > { %3409 = vst [vmem:[#allocation15_spill] sm:$0xff] %v2376_v53  ;;  %v559_v58 = vshrl.u32 %v2372_v36, 16  ;;  %v2383_v0 = vpack.c.b16 %v959_v50, %v958_v42  ;;  %v548_v6 = vrot.slane %v546_v54, 4  ;;  %v565_v7 = vshll.u32 %v2376_v53, 16 }
  0x4e   : > { %v443_v1 = vrot.slane %v442_v52, 4  ;;  %v438_v17 = vsel %vm2213_vm2, %v433_v51, %v437_v33  ;;  %v551_v19 = vrot.slane %v549_v55, 5  ;;  %v557_v23 = vrot.slane %v555_v57, 5  ;;  %v198_v55 = vld [vmem:[%s2178_s28 + $0xe0] sm:$0xff] }
  0x4f   : > { %3410 = vst [vmem:[#allocation16_spill] sm:$0xff] %v2383_v0  ;;  %v561_v24 = vrot.slane %v559_v58, 4  ;;  %1006 = vrot.lane.b32.xlu1 %v2383_v0, %s2096_s29  ;;  %v956_v30 = vunpack.c.l.b16 %v438_v17  ;;  %v567_v34 = vrot.slane %v565_v7, 5  ;;  %v2395_v41 = vpack.c.bf16 %v200_v56, %v200_v56 }
  0x50   : > { %v448_v29 = vsel %vm2213_vm2, %v443_v1, %v447_v48  ;;  %v552_v47 = vor.u32 %v551_v19, %v548_v6  ;;  %v2397_v50 = vpack.c.bf16 %v201_v16, %v201_v16  ;;  %v2399_v52 = vpack.c.bf16 %v202_v27, %v202_v27  ;;  %v199_v19 = vld [vmem:[%s2178_s28 + $0xe8] sm:$0x3] }
  0x51   : > { %v957_v42 = vunpack.c.l.b16 %v448_v29  ;;  %v562_v33 = vor.u32 %v561_v24, %v557_v23  ;;  %v522_v54 = vshrl.u32 %v2395_v41, 16  ;;  %v525_v51 = vshll.u32 %v2395_v41, 16 }
  0x52   : > { %v2404_v57 = vpack.c.bf16 %v197_v28, %v197_v28  ;;  %v553_v58 = vrot.slane %v552_v47, 4  ;;  %v531_v1 = vshll.u32 %v2397_v50, 16  ;;  %v535_v16 = vshrl.u32 %v2397_v50, 16 }
  0x53   : > { %v2406_v48 = vpack.c.b16 %v957_v42, %v956_v30  ;;  %v563_v56 = vrot.slane %v562_v33, 4  ;;  %v524_v6 = vrot.slane %v522_v54, 4  ;;  %v527_v7 = vrot.slane %v525_v51, 5 }
  0x54   : > { %v541_v17 = vshll.u32 %v2399_v52, 16  ;;  %v558_v24 = vsel %vm2213_vm2, %v553_v58, %v557_v23  ;;  %v533_v28 = vrot.slane %v531_v1, 5  ;;  %v2418_v29 = vpack.c.bf16 %v198_v55, %v198_v55  ;;  %v212_v23 = vld [vmem:[%s2178_s28 + $0x150] sm:$0xff]  ;;  %v213_v1 = vld [vmem:[%s2178_s28 + $0x158] sm:$0xff] }
  0x55   : > { %3411 = vst [vmem:[#allocation17_spill] sm:$0xff] %v2406_v48  ;;  %1004 = vrot.lane.b32.xlu0 %v2406_v48, %s2096_s29  ;;  %v568_v27 = vsel %vm2213_vm2, %v563_v56, %v567_v34  ;;  %v966_v30 = vunpack.c.l.b16 %v558_v24  ;;  %v528_v47 = vor.u32 %v527_v7, %v524_v6  ;;  %v537_v33 = vrot.slane %v535_v16, 4  ;;  %v214_v16 = vld [vmem:[%s2178_s28 + $0x160] sm:$0x3] }
  0x56   : > { %v967_v42 = vunpack.c.l.b16 %v568_v27  ;;  %v543_v54 = vrot.slane %v541_v17, 5  ;;  %v2420_v51 = vpack.c.bf16 %v199_v19, %v199_v19  ;;  %v498_v63 = vshrl.u32 %v2404_v57, 16 }
  0x57   : > { %v501_v15 = vshll.u32 %v2404_v57, 16  ;;  %v529_v34 = vrot.slane %v528_v47, 4  ;;  %v538_v56 = vor.u32 %v537_v33, %v533_v28  ;;  %v507_v55 = vshll.u32 %v2418_v29, 16 }
  0x58   : > { %v2425_v58 = vpack.c.b16 %v967_v42, %v966_v30  ;;  %v500_v24 = vrot.slane %v498_v63, 4  ;;  %v511_v6 = vshrl.u32 %v2418_v29, 16  ;;  %v517_v7 = vshll.u32 %v2420_v51, 16 }
  0x59   : > { %v503_v27 = vrot.slane %v501_v15, 5  ;;  %v534_v17 = vsel %vm2213_vm2, %v529_v34, %v533_v28  ;;  %v539_v19 = vrot.slane %v538_v56, 4  ;;  %v509_v30 = vrot.slane %v507_v55, 5 }
  0x5a   : > { %3412 = vst [vmem:[#allocation18_spill] sm:$0xff] %v2425_v58  ;;  %1014 = vrot.lane.b32.xlu2 %v2425_v58, %s2096_s29  ;;  %v2436_v42 = vpack.c.bf16 %v212_v23, %v212_v23  ;;  %v964_v47 = vunpack.c.l.b16 %v534_v17  ;;  %v513_v63 = vrot.slane %v511_v6, 4  ;;  %v519_v15 = vrot.slane %v517_v7, 5  ;;  %v210_v7 = vld [vmem:[%s2178_s28 + $0x140] sm:$0xff] }
  0x5b   : > { %v504_v33 = vor.u32 %v503_v27, %v500_v24  ;;  %v544_v59 = vsel %vm2213_vm2, %v539_v19, %v543_v54  ;;  %v2440_v0 = vpack.c.bf16 %v213_v1, %v213_v1  ;;  %v2442_v22 = vpack.c.bf16 %v214_v16, %v214_v16  ;;  %v209_v1 = vld [vmem:[%s2178_s28 + $0x138] sm:$0xff] }
  0x5c   : > { %3413 = vst [vmem:[#allocation19_spill] sm:$0xff] %v2436_v42  ;;  %v618_v28 = vshrl.u32 %v2436_v42, 16  ;;  %v965_v34 = vunpack.c.l.b16 %v544_v59  ;;  %v514_v56 = vor.u32 %v513_v63, %v509_v30  ;;  %v621_v55 = vshll.u32 %v2436_v42, 16  ;;  %v206_v63 = vld [vmem:[%s2178_s28 + $0x120] sm:$0xff] }
  0x5d   : > { %3414 = vst [vmem:[#allocation20_spill] sm:$0xff] %v2440_v0  ;;  %v505_v23 = vrot.slane %v504_v33, 4  ;;  %v627_v27 = vshll.u32 %v2440_v0, 16  ;;  %v631_v6 = vshrl.u32 %v2440_v0, 16  ;;  %v637_v54 = vshll.u32 %v2442_v22, 16 }
  0x5e   : > { %3415 = vst [vmem:[#allocation21_spill] sm:$0xff] %v2442_v22  ;;  %v620_v24 = vrot.slane %v618_v28, 4  ;;  %v2451_v16 = vpack.c.b16 %v965_v34, %v964_v47  ;;  %v515_v19 = vrot.slane %v514_v56, 4  ;;  %v623_v59 = vrot.slane %v621_v55, 5  ;;  %v211_v33 = vld [vmem:[%s2178_s28 + $0x148] sm:$0x3] }
  0x5f   : > { %v510_v17 = vsel %vm2213_vm2, %v505_v23, %v509_v30  ;;  %v629_v48 = vrot.slane %v627_v27, 5  ;;  %v633_v28 = vrot.slane %v631_v6, 4  ;;  %v639_v31 = vrot.slane %v637_v54, 5 }
  0x60   : > { %3416 = vst [vmem:[#allocation22_spill] sm:$0xff] %v2451_v16  ;;  %v962_v58 = vunpack.c.l.b16 %v510_v17  ;;  %1012 = vrot.lane.b32.xlu1 %v2451_v16, %s2096_s29  ;;  %v520_v18 = vsel %vm2213_vm2, %v515_v19, %v519_v15  ;;  %v624_v47 = vor.u32 %v623_v59, %v620_v24  ;;  %v2461_v34 = vpack.c.bf16 %v209_v1, %v209_v1  ;;  %v208_v59 = vld [vmem:[%s2178_s28 + $0x130] sm:$0x3] }
  0x61   : > { %v2463_v30 = vpack.c.bf16 %v210_v7, %v210_v7  ;;  %v963_v23 = vunpack.c.l.b16 %v520_v18  ;;  %v634_v56 = vor.u32 %v633_v28, %v629_v48  ;;  %v2465_v55 = vpack.c.bf16 %v211_v33, %v211_v33  ;;  %v207_v18 = vld [vmem:[%s2178_s28 + $0x128] sm:$0xff] }
  0x62   : > { %v2467_v27 = vpack.c.bf16 %v206_v63, %v206_v63  ;;  %v625_v6 = vrot.slane %v624_v47, 4  ;;  %v594_v54 = vshrl.u32 %v2461_v34, 16  ;;  %v597_v17 = vshll.u32 %v2461_v34, 16 }
  0x63   : > { %v603_v15 = vshll.u32 %v2463_v30, 16  ;;  %v2472_v19 = vpack.c.b16 %v963_v23, %v962_v58  ;;  %v635_v24 = vrot.slane %v634_v56, 4  ;;  %v607_v1 = vshrl.u32 %v2463_v30, 16 }
  0x64   : > { %v613_v7 = vshll.u32 %v2465_v55, 16  ;;  %v630_v33 = vsel %vm2213_vm2, %v625_v6, %v629_v48  ;;  %v596_v63 = vrot.slane %v594_v54, 4  ;;  %v599_v28 = vrot.slane %v597_v17, 5 }
  0x65   : > { %3417 = vst [vmem:[#allocation23_spill] sm:$0xff] %v2472_v19  ;;  %v605_v47 = vrot.slane %v603_v15, 5  ;;  %1010 = vrot.lane.b32.xlu0 %v2472_v19, %s2096_s29  ;;  %v640_v58 = vsel %vm2213_vm2, %v635_v24, %v639_v31  ;;  %v972_v23 = vunpack.c.l.b16 %v630_v33  ;;  %v609_v56 = vrot.slane %v607_v1, 4 }
  0x66   : > { %v615_v16 = vrot.slane %v613_v7, 5  ;;  %v973_v22 = vunpack.c.l.b16 %v640_v58  ;;  %v600_v42 = vor.u32 %v599_v28, %v596_v63  ;;  %v2484_v0 = vpack.c.bf16 %v207_v18, %v207_v18 }
  0x67   : > { %v2486_v53 = vpack.c.bf16 %v208_v59, %v208_v59  ;;  %v610_v13 = vor.u32 %v609_v56, %v605_v47  ;;  %v570_v48 = vshrl.u32 %v2467_v27, 16  ;;  %v573_v6 = vshll.u32 %v2467_v27, 16 }
  0x68   : > { %v2490_v54 = vpack.c.b16 %v973_v22, %v972_v23  ;;  %v601_v17 = vrot.slane %v600_v42, 4  ;;  %v579_v31 = vshll.u32 %v2484_v0, 16  ;;  %v583_v15 = vshrl.u32 %v2484_v0, 16 }
  0x69   : > { %v611_v24 = vrot.slane %v610_v13, 4  ;;  %v572_v1 = vrot.slane %v570_v48, 4  ;;  %v575_v7 = vrot.slane %v573_v6, 5  ;;  %v589_v18 = vshll.u32 %v2486_v53, 16 }
  0x6a   : > { %3418 = vst [vmem:[#allocation24_spill] sm:$0xff] %v2490_v54  ;;  %1020 = vrot.lane.b32.xlu2 %v2490_v54, %s2096_s29  ;;  %v606_v59 = vsel %vm2213_vm2, %v601_v17, %v605_v47  ;;  %v581_v33 = vrot.slane %v579_v31, 5  ;;  %v585_v63 = vrot.slane %v583_v15, 4  ;;  %v1924_v47 = vrot.slane %v2275_v49, 9 }
  0x6b   : > { %v616_v22 = vsel %vm2213_vm2, %v611_v24, %v615_v16  ;;  %v970_v42 = vunpack.c.l.b16 %v606_v59  ;;  %v576_v28 = vor.u32 %v575_v7, %v572_v1  ;;  %v591_v13 = vrot.slane %v589_v18, 5  ;;  %v215_v18 = vld [vmem:[%s2178_s28 + $0x168] sm:$0xff] }
  0x6c   : > { %v971_v23 = vunpack.c.l.b16 %v616_v22  ;;  %v586_v56 = vor.u32 %v585_v63, %v581_v33  ;;  %v725_v48 = vrot.slane %v2286_v62, 5  ;;  %v728_v16 = vrot.slane %v2288_v14, 5 }
  0x6d   : > { %v577_v6 = vrot.slane %v576_v28, 4  ;;  %v1923_v17 = vrot.slane %v2217_v37, 9  ;;  %v718_v31 = vrot.slane %v2219_v38, 5  ;;  %v216_v28 = vld [vmem:[%s2178_s28 + $0x170] sm:$0xff]  ;;  %v217_v37 = vld [vmem:[%s2178_s28 + $0x178] sm:$0x3] }
  0x6e   : > { %v2511_v15 = vpack.c.b16 %v971_v23, %v970_v42  ;;  %v587_v24 = vrot.slane %v586_v56, 4  ;;  %v726_v1 = vsel %vm2502_vm5, %v1924_v47, %v725_v48  ;;  %v727_v7 = vrot.slane %v725_v48, 4 }
  0x6f   : > { %v582_v59 = vsel %vm2213_vm2, %v577_v6, %v581_v33  ;;  %v1026_v63 = vunpack.c.l.b16 %v726_v1  ;;  %v719_v22 = vsel %vm2502_vm5, %v1923_v17, %v718_v31  ;;  %v720_v14 = vrot.slane %v718_v31, 4 }
  0x70   : > { %1018 = vrot.lane.b32.xlu1 %v2511_v15, %s2096_s29  ;;  %v592_v42 = vsel %vm2213_vm2, %v587_v24, %v591_v13  ;;  %v968_v23 = vunpack.c.l.b16 %v582_v59  ;;  %v729_v56 = vsel %vm2502_vm5, %v727_v7, %v728_v16  ;;  %v721_v47 = vrot.slane %v2221_v39, 5 }
  0x71   : > { %v969_v33 = vunpack.c.l.b16 %v592_v42  ;;  %v1027_v48 = vunpack.c.l.b16 %v729_v56  ;;  %v1024_v6 = vunpack.c.l.b16 %v719_v22  ;;  %v2529_v1 = vpack.c.bf16 %v215_v18, %v215_v18 }
  0x72   : > { %v722_v17 = vsel %vm2502_vm5, %v720_v14, %v721_v47  ;;  %v2533_v31 = vpack.c.bf16 %v216_v28, %v216_v28  ;;  %v2535_v38 = vpack.c.bf16 %v217_v37, %v217_v37  ;;  %v1927_v13 = vrot.slane %v2183_v3, 9 }
  0x73   : > { %v2538_v24 = vpack.c.b16 %v969_v33, %v968_v23  ;;  %v2540_v59 = vpack.c.b16 %v1027_v48, %v1026_v63  ;;  %v1025_v16 = vunpack.c.l.b16 %v722_v17  ;;  %v642_v39 = vshrl.u32 %v2529_v1, 16 }
  0x74   : > { %v645_v7 = vshll.u32 %v2529_v1, 16  ;;  %v651_v18 = vshll.u32 %v2533_v31, 16  ;;  %v655_v22 = vshrl.u32 %v2533_v31, 16  ;;  %v661_v14 = vshll.u32 %v2535_v38, 16 }
  0x75   : > { %3421 = vst [vmem:[#allocation25_spill] sm:$0xff] %v2538_v24  ;;  %1016 = vrot.lane.b32.xlu0 %v2538_v24, %s2096_s29  ;;  %1074 = vrot.lane.b32.xlu2 %v2540_v59, %s2097_s30  ;;  %v1056_v37 = vpack.c.b16 %v1025_v16, %v1024_v6  ;;  %v644_v63 = vrot.slane %v642_v39, 4  ;;  %v746_v28 = vrot.slane %v2185_v4, 5  ;;  %v749_v42 = vrot.slane %v2187_v5, 5 }
  0x76   : > { %3422 = vst [vmem:[#allocation26_spill] sm:$0xff] %v2540_v59  ;;  %v647_v23 = vrot.slane %v645_v7, 5  ;;  %v653_v56 = vrot.slane %v651_v18, 5  ;;  %v657_v47 = vrot.slane %v655_v22, 4  ;;  %v663_v33 = vrot.slane %v661_v14, 5 }
  0x77   : > { %v747_v48 = vsel %vm2502_vm5, %v1927_v13, %v746_v28  ;;  %v748_v17 = vrot.slane %v746_v28, 4  ;;  %v1926_v24 = vrot.slane %v2266_v40, 9  ;;  %v739_v54 = vrot.slane %v2268_v44, 5 }
  0x78   : > { %1072 = vrot.lane.b32.xlu1 %v1056_v37, %s2097_s30  ;;  %v648_v6 = vor.u32 %v647_v23, %v644_v63  ;;  %v658_v16 = vor.u32 %v657_v47, %v653_v56  ;;  %v1032_v39 = vunpack.c.l.b16 %v747_v48  ;;  %v742_v59 = vrot.slane %v2270_v45, 5 }
  0x79   : > { %v750_v5 = vsel %vm2502_vm5, %v748_v17, %v749_v42  ;;  %v740_v7 = vsel %vm2502_vm5, %v1926_v24, %v739_v54  ;;  %v741_v18 = vrot.slane %v739_v54, 4  ;;  %v1925_v13 = vrot.slane %v2192_v9, 9 }
  0x7a   : > { %v649_v22 = vrot.slane %v648_v6, 4  ;;  %v659_v14 = vrot.slane %v658_v16, 4  ;;  %v1033_v28 = vunpack.c.l.b16 %v750_v5  ;;  %v1030_v19 = vunpack.c.l.b16 %v740_v7 }
  0x7b   : > { %v743_v37 = vsel %vm2502_vm5, %v741_v18, %v742_v59  ;;  %v732_v63 = vrot.slane %v2194_v10, 5  ;;  %v735_v45 = vrot.slane %v2196_v11, 5  ;;  %v1930_v23 = vrot.slane %v2329_v20, 9 }
  0x7c   : > { %v654_v42 = vsel %vm2213_vm2, %v649_v22, %v653_v56  ;;  %v664_v54 = vsel %vm2213_vm2, %v659_v14, %v663_v33  ;;  %v2573_v24 = vpack.c.b16 %v1033_v28, %v1032_v39  ;;  %v1031_v47 = vunpack.c.l.b16 %v743_v37 }
  0x7d   : > { %v974_v48 = vunpack.c.l.b16 %v654_v42  ;;  %v975_v17 = vunpack.c.l.b16 %v664_v54  ;;  %v733_v59 = vsel %vm2502_vm5, %v1925_v13, %v732_v63  ;;  %v734_v6 = vrot.slane %v732_v63, 4 }
  0x7e   : > { %1080 = vrot.lane.b32.xlu2 %v2573_v24, %s2097_s30  ;;  %v2579_v11 = vpack.c.b16 %v1031_v47, %v1030_v19  ;;  %v1028_v16 = vunpack.c.l.b16 %v733_v59  ;;  %v767_v56 = vrot.slane %v2331_v21, 5  ;;  %v770_v5 = vrot.slane %v2333_v25, 5 }
  0x7f   : > { %v2583_v33 = vpack.c.b16 %v975_v17, %v974_v48  ;;  %v736_v39 = vsel %vm2502_vm5, %v734_v6, %v735_v45  ;;  %v1929_v7 = vrot.slane %v2335_v26, 9  ;;  %v760_v18 = vrot.slane %v2353_v60, 5 }
  0x80   : > { %1078 = vrot.lane.b32.xlu1 %v2579_v11, %s2097_s30  ;;  %v1029_v13 = vunpack.c.l.b16 %v736_v39  ;;  %v768_v19 = vsel %vm2502_vm5, %v1930_v23, %v767_v56  ;;  %v769_v22 = vrot.slane %v767_v56, 4  ;;  %v763_v14 = vrot.slane %v2355_v61, 5 }
  0x81   : > { %1022 = vrot.lane.b32.xlu0 %v2583_v33, %s2096_s29  ;;  %v1038_v25 = vunpack.c.l.b16 %v768_v19  ;;  %v761_v28 = vsel %vm2502_vm5, %v1929_v7, %v760_v18  ;;  %v762_v37 = vrot.slane %v760_v18, 4  ;;  %v1928_v63 = vrot.slane %v2239_v2, 9 }
  0x82   : > { %v771_v45 = vsel %vm2502_vm5, %v769_v22, %v770_v5  ;;  %v1036_v42 = vunpack.c.l.b16 %v761_v28  ;;  %v753_v54 = vrot.slane %v2243_v8, 5  ;;  %v756_v47 = vrot.slane %v2245_v12, 5 }
  0x83   : > { %v1039_v23 = vunpack.c.l.b16 %v771_v45  ;;  %v764_v61 = vsel %vm2502_vm5, %v762_v37, %v763_v14  ;;  %v1933_v48 = vrot.slane %v2395_v41, 9  ;;  %v2606_v17 = vpack.c.b16 %v1029_v13, %v1028_v16 }
  0x84   : > { %v1037_v59 = vunpack.c.l.b16 %v764_v61  ;;  %v755_v6 = vrot.slane %v753_v54, 4  ;;  %v788_v56 = vrot.slane %v2397_v50, 5  ;;  %v754_v5 = vsel %vm2502_vm5, %v1928_v63, %v753_v54 }
  0x85   : > { %v2609_v39 = vpack.c.b16 %v1039_v23, %v1038_v25  ;;  %v791_v7 = vrot.slane %v2399_v52, 5  ;;  %v1932_v18 = vrot.slane %v2404_v57, 9  ;;  %v781_v14 = vrot.slane %v2418_v29, 5 }
  0x86   : > { %v2615_v19 = vpack.c.b16 %v1037_v59, %v1036_v42  ;;  %v757_v12 = vsel %vm2502_vm5, %v755_v6, %v756_v47  ;;  %v789_v16 = vsel %vm2502_vm5, %v1933_v48, %v788_v56  ;;  %v790_v13 = vrot.slane %v788_v56, 4 }
  0x87   : > { %1086 = vrot.lane.b32.xlu2 %v2609_v39, %s2097_s30  ;;  %v1044_v22 = vunpack.c.l.b16 %v789_v16  ;;  %v784_v25 = vrot.slane %v2420_v51, 5  ;;  %v1034_v52 = vunpack.c.l.b16 %v754_v5  ;;  %v1035_v28 = vunpack.c.l.b16 %v757_v12 }
  0x88   : > { %1084 = vrot.lane.b32.xlu1 %v2615_v19, %s2097_s30  ;;  %v792_v37 = vsel %vm2502_vm5, %v790_v13, %v791_v7  ;;  %v774_v63 = vrot.slane %v2308_v43, 5  ;;  %v782_v42 = vsel %vm2502_vm5, %v1932_v18, %v781_v14  ;;  %v783_v54 = vrot.slane %v781_v14, 4 }
  0x89   : > { %1076 = vrot.lane.b32.xlu0 %v2606_v17, %s2097_s30  ;;  %v1045_v45 = vunpack.c.l.b16 %v792_v37  ;;  %v1931_v51 = vrot.slane %v2304_v32, 9  ;;  %v1042_v23 = vunpack.c.l.b16 %v782_v42  ;;  %v777_v47 = vrot.slane %v2310_v46, 5 }
  0x8a   : > { %v776_v61 = vrot.slane %v774_v63, 4  ;;  %v1936_v48 = vrot.slane %v2461_v34, 9  ;;  %v785_v6 = vsel %vm2502_vm5, %v783_v54, %v784_v25  ;;  %v809_v56 = vrot.slane %v2463_v30, 5 }
  0x8b   : > { %v2637_v59 = vpack.c.b16 %v1045_v45, %v1044_v22  ;;  %v1043_v5 = vunpack.c.l.b16 %v785_v6  ;;  %v812_v7 = vrot.slane %v2465_v55, 5  ;;  %v1935_v18 = vrot.slane %v2467_v27, 9 }
  0x8c   : > { %v2644_v12 = vpack.c.b16 %v1035_v28, %v1034_v52  ;;  %v810_v16 = vsel %vm2502_vm5, %v1936_v48, %v809_v56  ;;  %v811_v46 = vrot.slane %v809_v56, 4  ;;  %v802_v13 = vrot.slane %v2484_v0, 5  ;;  %v3423_v48 = vld [vmem:[#allocation13_spill] sm:$0xff] }
  0x8d   : > { %v2649_v22 = vpack.c.b16 %v1043_v5, %v1042_v23  ;;  %v775_v14 = vsel %vm2502_vm5, %v1931_v51, %v774_v63  ;;  %v778_v25 = vsel %vm2502_vm5, %v776_v61, %v777_v47  ;;  %v805_v55 = vrot.slane %v2486_v53, 5  ;;  %v3424_v5 = vld [vmem:[#allocation15_spill] sm:$0xff] }
  0x8e   : > { %v813_v52 = vsel %vm2502_vm5, %v811_v46, %v812_v7  ;;  %v1050_v28 = vunpack.c.l.b16 %v810_v16  ;;  %v803_v37 = vsel %vm2502_vm5, %v1935_v18, %v802_v13  ;;  %v804_v45 = vrot.slane %v802_v13, 4 }
  0x8f   : > { %1092 = vrot.lane.b32.xlu2 %v2637_v59, %s2097_s30  ;;  %v1051_v63 = vunpack.c.l.b16 %v813_v52  ;;  %v1048_v42 = vunpack.c.l.b16 %v803_v37  ;;  %v795_v54 = vrot.slane %v2372_v36, 5  ;;  %v1040_v53 = vunpack.c.l.b16 %v775_v14 }
  0x90   : > { %1090 = vrot.lane.b32.xlu1 %v2649_v22, %s2097_s30  ;;  %v1041_v51 = vunpack.c.l.b16 %v778_v25  ;;  %v806_v23 = vsel %vm2502_vm5, %v804_v45, %v805_v55  ;;  %v1938_v61 = vrot.slane %v2529_v1, 9  ;;  %v1934_v6 = vrot.slane %v3423_v48, 9 }
  0x91   : > { %1082 = vrot.lane.b32.xlu0 %v2644_v12, %s2097_s30  ;;  %v1049_v47 = vunpack.c.l.b16 %v806_v23  ;;  %v797_v56 = vrot.slane %v795_v54, 4  ;;  %v798_v7 = vrot.slane %v3424_v5, 5  ;;  %v2672_v18 = vpack.c.b16 %v1051_v63, %v1050_v28  ;;  %v3425_v28 = vld [vmem:[#allocation20_spill] sm:$0xff] }
  0x92   : > { %v823_v16 = vrot.slane %v2533_v31, 5  ;;  %v826_v46 = vrot.slane %v2535_v38, 5  ;;  %v2678_v14 = vpack.c.b16 %v1041_v51, %v1040_v53  ;;  %v796_v52 = vsel %vm2502_vm5, %v1934_v6, %v795_v54 }
  0x93   : > { %v2676_v13 = vpack.c.b16 %v1049_v47, %v1048_v42  ;;  %v799_v37 = vsel %vm2502_vm5, %v797_v56, %v798_v7  ;;  %v816_v45 = vrot.slane %v3425_v28, 5  ;;  %v898_v38 = vunpack.c.l.b16 %v2275_v49  ;;  %v3427_v56 = vld [vmem:[#allocation21_spill] sm:$0xff]  ;;  %v2701_v7 = vpop.permute.xlu2 %1000 }
  0x94   : > { %v824_v25 = vsel %vm2502_vm5, %v1938_v61, %v823_v16  ;;  %v825_v55 = vrot.slane %v823_v16, 4  ;;  %v899_v63 = vunpack.c.l.b16 %v2286_v62  ;;  %v1046_v51 = vunpack.c.l.b16 %v796_v52  ;;  %v3426_v61 = vld [vmem:[#allocation19_spill] sm:$0xff] }
  0x95   : > { %v1054_v53 = vunpack.c.l.b16 %v824_v25  ;;  %v1047_v23 = vunpack.c.l.b16 %v799_v37  ;;  %v1937_v47 = vrot.slane %v3426_v61, 9  ;;  %v818_v6 = vrot.slane %v816_v45, 4 }
  0x96   : > { %v827_v42 = vsel %vm2502_vm5, %v825_v55, %v826_v46  ;;  %v819_v49 = vrot.slane %v3427_v56, 5  ;;  %v929_v5 = vpack.c.b16 %v899_v63, %v898_v38  ;;  %v904_v55 = vunpack.c.l.b16 %v2183_v3 }
  0x97   : > { %1098 = vrot.lane.b32.xlu2 %v2672_v18, %s2097_s30  ;;  %v1055_v54 = vunpack.c.l.b16 %v827_v42  ;;  %v2703_v16 = vpack.c.b16 %v1047_v23, %v1046_v51  ;;  %v817_v46 = vsel %vm2502_vm5, %v1937_v47, %v816_v45  ;;  %v905_v52 = vunpack.c.l.b16 %v2185_v4 }
  0x98   : > { %1096 = vrot.lane.b32.xlu1 %v2676_v13, %s2097_s30  ;;  %v820_v25 = vsel %vm2502_vm5, %v818_v6, %v819_v49  ;;  %v1052_v37 = vunpack.c.l.b16 %v817_v46  ;;  %v902_v38 = vunpack.c.l.b16 %v2266_v40  ;;  %v903_v63 = vunpack.c.l.b16 %v2268_v44 }
  0x99   : > { %1088 = vrot.lane.b32.xlu0 %v2678_v14, %s2097_s30  ;;  %v2699_v62 = vpack.c.b16 %v1055_v54, %v1054_v53  ;;  %v1053_v45 = vunpack.c.l.b16 %v820_v25  ;;  %v922_v42 = vunpack.c.l.b16 %v2461_v34  ;;  %v923_v53 = vunpack.c.l.b16 %v2463_v30 }
  0x9a   : > { %v920_v3 = vunpack.c.l.b16 %v2467_v27  ;;  %v921_v4 = vunpack.c.l.b16 %v2484_v0  ;;  %v2722_v54 = vpack.c.b16 %v905_v52, %v904_v55  ;;  %v2726_v23 = vpack.c.b16 %v903_v63, %v902_v38 }
  0x9b   : > { %v2724_v51 = vpack.c.b16 %v923_v53, %v922_v42  ;;  %v900_v40 = vunpack.c.l.b16 %v2192_v9  ;;  %v901_v44 = vunpack.c.l.b16 %v2194_v10  ;;  %v2732_v6 = vpack.c.b16 %v1053_v45, %v1052_v37  ;;  %v2734_v34 = vpop.permute.xlu2 %1002 }
  0x9c   : > { %v2730_v47 = vpack.c.b16 %v921_v4, %v920_v3  ;;  %v910_v0 = vunpack.c.l.b16 %v2329_v20  ;;  %v911_v30 = vunpack.c.l.b16 %v2331_v21  ;;  %v908_v10 = vunpack.c.l.b16 %v2335_v26 }
  0x9d   : > { %v2742_v9 = vpack.c.b16 %v901_v44, %v900_v40  ;;  %v909_v27 = vunpack.c.l.b16 %v2353_v60  ;;  %v916_v26 = vunpack.c.l.b16 %v2395_v41  ;;  %v917_v60 = vunpack.c.l.b16 %v2397_v50 }
  0x9e   : > { %v2752_v20 = vpack.c.b16 %v911_v30, %v910_v0  ;;  %v914_v25 = vunpack.c.l.b16 %v2404_v57  ;;  %v915_v55 = vunpack.c.l.b16 %v2418_v29  ;;  %v906_v37 = vunpack.c.l.b16 %v2239_v2  ;;  %v3428_v0 = vld [vmem:[#allocation23_spill] sm:$0xff] }
  0x9f   : > { %1107 = vrot.lane.b32.xlu2 %v929_v5, %s2098_s4  ;;  %v2754_v21 = vpack.c.b16 %v909_v27, %v908_v10  ;;  %v907_v38 = vunpack.c.l.b16 %v2243_v8  ;;  %v938_v63 = vpack.c.b16 %v917_v60, %v916_v26  ;;  %v912_v2 = vunpack.c.l.b16 %v2304_v32  ;;  %v3429_v26 = vld [vmem:[#allocation24_spill] sm:$0xff] }
  0xa0   : > { %1102 = vrot.lane.b32.xlu1 %v2699_v62, %s2097_s30  ;;  %v997_v56 = vpop.permute.xlu1 %996  ;;  %v2772_v41 = vpack.c.b16 %v915_v55, %v914_v25  ;;  %v913_v8 = vunpack.c.l.b16 %v2308_v43  ;;  %v925_v3 = vunpack.c.l.b16 %v3425_v28  ;;  %v918_v32 = vunpack.c.l.b16 %v3423_v48 }
  0xa1   : > { %1094 = vrot.lane.b32.xlu0 %v2703_v16, %s2097_s30  ;;  %v2750_v49 = vsel %vm1314_vm6, %v2742_v9, %v997_v56  ;;  %v2774_v50 = vpack.c.b16 %v907_v38, %v906_v37  ;;  %v919_v43 = vunpack.c.l.b16 %v2372_v36  ;;  %v1329_v56 = vsel %vm1314_vm6, %v2722_v54, %v2701_v7  ;;  %v3430_v37 = vld [vmem:[#allocation10_spill] sm:$0xff]  ;;  %v3431_v38 = vld [vmem:[#allocation12_spill] sm:$0xff] }
  0xa2   : > { %v2786_v42 = vpack.c.b16 %v913_v8, %v912_v2  ;;  %v3434_v8 = vld [vmem:[#allocation7_spill] sm:$0xff] }
  0xa3   : > { %v2766_v52 = vpop.permute.xlu2 %1008  ;;  %v2802_v44 = vpack.c.b16 %v919_v43, %v918_v32 }
  0xa5   : > { %v2756_v46 = vpop.permute.xlu0 %992 }
  0xa7   : > { %1113 = vrot.lane.b32.xlu2 %v2722_v54, %s2098_s4 }
  0xa8   : > { %1111 = vrot.lane.b32.xlu1 %v2726_v23, %s2098_s4 }
  0xa9   : > { %1100 = vrot.lane.b32.xlu0 %v2732_v6, %s2097_s30 }
  0xaf   : > { %1119 = vrot.lane.b32.xlu2 %v2752_v20, %s2098_s4 }
  0xb0   : > { %1117 = vrot.lane.b32.xlu1 %v2754_v21, %s2098_s4 }
  0xb1   : > { %1109 = vrot.lane.b32.xlu0 %v2742_v9, %s2098_s4  ;;  %v2788_v53 = vpop.permute.xlu1 %998 }
  0xb4   : > { %v2784_v29 = vpop.permute.xlu2 %1014 }
  0xb6   : > { %v995_v45 = vpop.permute.xlu0 %994 }
  0xb7   : > { %1125 = vrot.lane.b32.xlu2 %v938_v63, %s2098_s4  ;;  %v1320_v57 = vsel %vm1314_vm6, %v929_v5, %v995_v45  ;;  %v924_v5 = vunpack.c.l.b16 %v3426_v61 }
  0xb8   : > { %1123 = vrot.lane.b32.xlu1 %v2772_v41, %s2098_s4 }
  0xb9   : > { %1115 = vrot.lane.b32.xlu0 %v2774_v50, %s2098_s4  ;;  %v2800_v4 = vpack.c.b16 %v925_v3, %v924_v5  ;;  %v897_v5 = vunpack.c.l.b16 %v3434_v8 }
  0xbf   : > { %1131 = vrot.lane.b32.xlu2 %v2724_v51, %s2098_s4 }
  0xc0   : > { %1129 = vrot.lane.b32.xlu1 %v2730_v47, %s2098_s4 }
  0xc1   : > { %1121 = vrot.lane.b32.xlu0 %v2786_v42, %s2098_s4  ;;  %v1007_v48 = vpop.permute.xlu1 %1006 }
  0xc2   : > { %v1338_v7 = vsel %vm1314_vm6, %v2752_v20, %v1007_v48 }
  0xc4   : > { %v1021_v40 = vpop.permute.xlu2 %1020 }
  0xc5   : > { %v2806_v61 = vsel %vm1314_vm6, %v2800_v4, %v1021_v40 }
  0xc7   : > { %1193 = vrot.lane.b32.xlu2 %v2649_v22, %s2099_s5  ;;  %v1005_v27 = vpop.permute.xlu0 %1004 }
  0xc8   : > { %1166 = vrot.lane.b32.xlu1 %v2511_v15, %s2100_s6 }
  0xc9   : > { %1127 = vrot.lane.b32.xlu0 %v2802_v44, %s2098_s4 }
  0xcf   : > { %1236 = vrot.lane.b32.xlu2 %v2800_v4, %s2101_s7  ;;  %v1075_v36 = vpop.permute.xlu2 %1074 }
  0xd0   : > { %1228 = vrot.lane.b32.xlu1 %v938_v63, %s2101_s7  ;;  %v2818_v28 = vsel %vm1363_vm7, %v1320_v57, %v1075_v36  ;;  %v3433_v57 = vld [vmem:[#allocation6_spill] sm:$0xff] }
  0xd1   : > { %1158 = vrot.lane.b32.xlu0 %v3428_v0, %s2100_s6  ;;  %v896_v2 = vunpack.c.l.b16 %v3433_v57  ;;  %v3436_v57 = vld [vmem:[#allocation9_spill] sm:$0xff] }
  0xd2   : > { %v1013_v30 = vpop.permute.xlu1 %1012 }
  0xd3   : > { %v1347_v10 = vsel %vm1314_vm6, %v938_v63, %v1013_v30  ;;  %v3432_v63 = vld [vmem:[#allocation22_spill] sm:$0xff]  ;;  %v928_v43 = vpack.c.b16 %v897_v5, %v896_v2 }
  0xd5   : > { %v1317_v36 = vsel %vm1314_vm6, %v928_v43, %v2756_v46 }
  0xd7   : > { %1298 = vrot.lane.b32.xlu2 %v2637_v59, %s2102_s8  ;;  %v1011_v55 = vpop.permute.xlu0 %1010 }
  0xd8   : > { %1271 = vrot.lane.b32.xlu1 %v3429_v26, %s2103_s9  ;;  %v1081_v60 = vpop.permute.xlu2 %1080 }
  0xd9   : > { %1201 = vrot.lane.b32.xlu0 %v2672_v18, %s2099_s5  ;;  %v2833_v25 = vsel %vm1363_vm7, %v1329_v56, %v1081_v60 }
  0xdf   : > { %1150 = vrot.lane.b32.xlu2 %v3430_v37, %s2100_s6 }
  0xe0   : > { %1142 = vrot.lane.b32.xlu1 %v3431_v38, %s2100_s6  ;;  %v926_v38 = vunpack.c.l.b16 %v2529_v1  ;;  %v1326_v1 = vsel %vm1314_vm6, %v2726_v23, %v2788_v53 }
  0xe1   : > { %1263 = vrot.lane.b32.xlu0 %v3432_v63, %s2103_s9  ;;  %v1087_v45 = vpop.permute.xlu2 %1086 }
  0xe2   : > { %v1019_v3 = vpop.permute.xlu1 %1018  ;;  %v2846_v32 = vsel %vm1363_vm7, %v1338_v7, %v1087_v45  ;;  %v3435_v7 = vld [vmem:[#allocation17_spill] sm:$0xff] }
  0xe3   : > { %v1356_v46 = vsel %vm1314_vm6, %v2724_v51, %v1019_v3  ;;  %v1335_v3 = vsel %vm1314_vm6, %v2754_v21, %v1005_v27  ;;  %v1344_v27 = vsel %vm1314_vm6, %v2772_v41, %v1011_v55 }
  0xe7   : > { %1212 = vrot.lane.b32.xlu2 %v2742_v9, %s2101_s7  ;;  %v1017_v40 = vpop.permute.xlu0 %1016  ;;  %v927_v9 = vunpack.c.l.b16 %v2533_v31 }
  0xe8   : > { %1185 = vrot.lane.b32.xlu1 %v2644_v12, %s2099_s5 }
  0xe9   : > { %1306 = vrot.lane.b32.xlu0 %v2732_v6, %s2102_s8  ;;  %v1093_v48 = vpop.permute.xlu2 %1092  ;;  %v2864_v45 = vpack.c.b16 %v927_v9, %v926_v38 }
  0xea   : > { %v2857_v30 = vsel %vm1363_vm7, %v1347_v10, %v1093_v48  ;;  %v1073_v56 = vpop.permute.xlu1 %1072  ;;  %v3437_v10 = vld [vmem:[#allocation26_spill] sm:$0xff] }
  0xeb   : > { %v1365_v60 = vsel %vm1363_vm7, %v1317_v36, %v1073_v56 }
  0xef   : > { %1255 = vrot.lane.b32.xlu2 %v3435_v7, %s2103_s9 }
  0xf0   : > { %1247 = vrot.lane.b32.xlu1 %v3436_v57, %s2103_s9 }
  0xf1   : > { %1177 = vrot.lane.b32.xlu0 %v3437_v10, %s2099_s5  ;;  %v1099_v2 = vpop.permute.xlu2 %1098 }
  0xf2   : > { %v2876_v31 = vsel %vm1363_vm7, %v1356_v46, %v1099_v2  ;;  %v1079_v8 = vpop.permute.xlu1 %1078  ;;  %v1353_v2 = vsel %vm1314_vm6, %v2730_v47, %v1017_v40 }
  0xf3   : > { %v1023_v5 = vpop.permute.xlu0 %1022  ;;  %v1371_v43 = vsel %vm1363_vm7, %v1326_v1, %v1079_v8  ;;  %v1341_v8 = vsel %vm1314_vm6, %v2786_v42, %v2766_v52 }
  0xf4   : > { %v1362_v48 = vsel %vm1314_vm6, %v2864_v45, %v1023_v5 }
  0xf7   : > { %1133 = vrot.lane.b32.xlu2 %v2800_v4, %s2098_s4 }
  0xf8   : > { %1290 = vrot.lane.b32.xlu1 %v2615_v19, %s2102_s8 }
  0xf9   : > { %1220 = vrot.lane.b32.xlu0 %v2754_v21, %s2101_s7  ;;  %v1108_v53 = vpop.permute.xlu2 %1107 }
  0xfa   : > { %v2890_v36 = vsel %vm1396_vm8, %v1365_v60, %v1108_v53  ;;  %v1085_v56 = vpop.permute.xlu1 %1084 }
  0xfb   : > { %v1077_v38 = vpop.permute.xlu0 %1076  ;;  %v1377_v9 = vsel %vm1363_vm7, %v1335_v3, %v1085_v56  ;;  %v1350_v3 = vsel %vm1314_vm6, %v2802_v44, %v2784_v29 }
  0xfc   : > { %v1369_v4 = vsel %vm1363_vm7, %v2750_v49, %v1077_v38  ;;  %v1332_v49 = vsel %vm1314_vm6, %v2774_v50, %v2734_v34 }
  0xff   : > { %1195 = vrot.lane.b32.xlu2 %v2637_v59, %s2099_s5 }
 0x100   : > { %1168 = vrot.lane.b32.xlu1 %v3429_v26, %s2100_s6 }
 0x101   : > { %1282 = vrot.lane.b32.xlu0 %v2606_v17, %s2102_s8  ;;  %v1114_v21 = vpop.permute.xlu2 %1113 }
 0x102   : > { %v2904_v60 = vsel %vm1396_vm8, %v1371_v43, %v1114_v21  ;;  %v1091_v46 = vpop.permute.xlu1 %1090 }
 0x103   : > { %v1083_v10 = vpop.permute.xlu0 %1082  ;;  %v1383_v59 = vsel %vm1363_vm7, %v1344_v27, %v1091_v46 }
 0x104   : > { %v1375_v26 = vsel %vm1363_vm7, %v1332_v49, %v1083_v10  ;;  %v218_v49 = vld [vmem:[%s2178_s28 + $0x180] sm:$0xff] }
 0x107   : > { %1238 = vrot.lane.b32.xlu2 %v2864_v45, %s2101_s7 }
 0x108   : > { %1230 = vrot.lane.b32.xlu1 %v2802_v44, %s2101_s7 }
 0x109   : > { %1160 = vrot.lane.b32.xlu0 %v3432_v63, %s2100_s6  ;;  %v1120_v55 = vpop.permute.xlu2 %1119 }
 0x10a   : > { %v2920_v34 = vsel %vm1396_vm8, %v1377_v9, %v1120_v55  ;;  %v1097_v1 = vpop.permute.xlu1 %1096  ;;  %v3440_v55 = vld [vmem:[#allocation11_spill] sm:$0xff] }
 0x10b   : > { %v1089_v5 = vpop.permute.xlu0 %1088  ;;  %v2926_v43 = vsel %vm1363_vm7, %v1353_v2, %v1097_v1  ;;  %v2990_v2 = vpack.c.bf16 %v218_v49, %v218_v49 }
 0x10c   : > { %v2929_v53 = vsel %vm1363_vm7, %v1341_v8, %v1089_v5 }
 0x10f   : > { %1300 = vrot.lane.b32.xlu2 %v2703_v16, %s2102_s8 }
 0x110   : > { %1273 = vrot.lane.b32.xlu1 %v2583_v33, %s2103_s9 }
 0x111   : > { %1203 = vrot.lane.b32.xlu0 %v2732_v6, %s2099_s5  ;;  %v1126_v63 = vpop.permute.xlu2 %1125  ;;  %v3438_v6 = vld [vmem:[#allocation18_spill] sm:$0xff] }
 0x112   : > { %v2938_v40 = vsel %vm1396_vm8, %v1383_v59, %v1126_v63  ;;  %v1103_v52 = vpop.permute.xlu1 %1102  ;;  %v3439_v59 = vld [vmem:[#allocation16_spill] sm:$0xff] }
 0x113   : > { %v1095_v56 = vpop.permute.xlu0 %1094  ;;  %v2944_v38 = vsel %vm1363_vm7, %v1362_v48, %v1103_v52  ;;  %v1971_v52 = vld [vmem:[%s3357_s1 + $0x8] sm:$0xff] }
 0x114   : > { %v1387_v9 = vsel %vm1363_vm7, %v1350_v3, %v1095_v56  ;;  %v829_v3 = vshrl.u32 %v2990_v2, 16  ;;  %v832_v56 = vshll.u32 %v2990_v2, 16 }
 0x116   : > { %v834_v49 = vrot.slane %v832_v56, 5 }
 0x117   : > { %1152 = vrot.lane.b32.xlu2 %v3435_v7, %s2100_s6 }
 0x118   : > { %1144 = vrot.lane.b32.xlu1 %v3436_v57, %s2100_s6 }
 0x119   : > { %1265 = vrot.lane.b32.xlu0 %v3438_v6, %s2103_s9  ;;  %v2953_v21 = vpop.permute.xlu2 %1131 }
 0x11a   : > { %v1112_v29 = vpop.permute.xlu1 %1111 }
 0x11b   : > { %v1101_v44 = vpop.permute.xlu0 %1100  ;;  %v2956_v48 = vsel %vm1396_vm8, %v1369_v4, %v1112_v29 }
 0x11c   : > { %v2960_v27 = vsel %vm1363_vm7, %v2806_v61, %v1101_v44 }
 0x11f   : > { %1214 = vrot.lane.b32.xlu2 %v2726_v23, %s2101_s7  ;;  %v1598_v23 = vld [vmem:[%s3357_s1 + $0x10] sm:$0x3] }
 0x120   : > { %1187 = vrot.lane.b32.xlu1 %v2615_v19, %s2099_s5  ;;  %v219_v19 = vld [vmem:[%s2178_s28 + $0x188] sm:$0xff]  ;;  %v1608_v10 = vunpack.c.l.b16 %v1598_v23  ;;  %v831_v23 = vrot.slane %v829_v3, 4 }
 0x121   : > { %1308 = vrot.lane.b32.xlu0 %v2699_v62, %s2102_s8  ;;  %v2968_v7 = vpop.permute.xlu2 %1193  ;;  %v2992_v1 = vpack.c.bf16 %v219_v19, %v219_v19 }
 0x122   : > { %v1118_v57 = vpop.permute.xlu1 %1117  ;;  %v835_v3 = vor.u32 %v834_v49, %v831_v23 }
 0x123   : > { %v1110_v46 = vpop.permute.xlu0 %1109  ;;  %v2971_v4 = vsel %vm1396_vm8, %v1375_v26, %v1118_v57  ;;  %v1611_v26 = vpack.c.b16 %v1608_v10, %v1608_v10  ;;  %v838_v29 = vshll.u32 %v2992_v1, 16  ;;  %v842_v44 = vshrl.u32 %v2992_v1, 16 }
 0x124   : > { %v2975_v61 = vsel %vm1396_vm8, %v2818_v28, %v1110_v46 }
 0x125   : > { %v1649_v5 = vsel %vm1647_vm9, %v1611_v26, 0  ;;  %v840_v19 = vrot.slane %v838_v29, 5  ;;  %v844_v10 = vrot.slane %v842_v44, 4  ;;  %v1970_v26 = vld [vmem:[%s3357_s1] sm:$0xff]  ;;  %v1105_v44 = vunpack.c.l.b16 %v2992_v1 }
 0x126   : > { %1974 = vmatpush.bf16.msra.mxu2 %v1649_v5  ;;  %1975 = vmatpush.bf16.msra.mxu3 %v1649_v5 }
 0x127   : > { %1257 = vrot.lane.b32.xlu2 %v3439_v59, %s2103_s9  ;;  %1656 = vmatpush.bf16.msra.mxu0 %v1649_v5  ;;  %v845_v56 = vor.u32 %v844_v10, %v840_v19 }
 0x128   : > { %1249 = vrot.lane.b32.xlu1 %v3440_v55, %s2103_s9  ;;  %1973 = vmatpush.bf16.msra.mxu1 %v1649_v5 }
 0x129   : > { %1179 = vrot.lane.b32.xlu0 %v2606_v17, %s2099_s5  ;;  %v2988_v28 = vpop.permute.xlu2 %1236  ;;  %v220_v17 = vld [vmem:[%s2178_s28 + $0x190] sm:$0x3]  ;;  %v846_v23 = vrot.slane %v845_v56, 4 }
 0x12a   : > { %v2994_v8 = vpop.permute.xlu1 %1123  ;;  %1977 = vmatpush.bf16.msra.mxu2 %v1971_v52  ;;  %v274_v57 = vpack.c.bf16 %v220_v17, %v220_v17  ;;  %1978 = vmatpush.bf16.msra.mxu3 %v1971_v52 }
 0x12b   : > { %v2996_v63 = vpop.permute.xlu0 %1115  ;;  %1657 = vmatpush.bf16.msra.mxu0 %v1971_v52 }
 0x12c   : > { %1976 = vmatpush.bf16.msra.mxu1 %v1971_v52  ;;  %v848_v29 = vshll.u32 %v274_v57, 16  ;;  %v1104_v52 = vunpack.c.l.b16 %v2990_v2 }
 0x12e   : > { %1980 = vmatpush.bf16.msra.mxu2 %v1970_v26  ;;  %1981 = vmatpush.bf16.msra.mxu3 %v1970_v26  ;;  %v850_v49 = vrot.slane %v848_v29, 5 }
 0x12f   : > { %1135 = vrot.lane.b32.xlu2 %v2864_v45, %s2098_s4  ;;  %1658 = vmatpush.bf16.msra.mxu0 %v1970_v26 }
 0x130   : > { %1292 = vrot.lane.b32.xlu1 %v2609_v39, %s2102_s8  ;;  %1979 = vmatpush.bf16.msra.mxu1 %v1970_v26 }
 0x131   : > { %1222 = vrot.lane.b32.xlu0 %v2752_v20, %s2101_s7  ;;  %v3012_v46 = vpop.permute.xlu2 %1298 }
 0x132   : > { %v1130_v45 = vpop.permute.xlu1 %1129 }
 0x133   : > { %v1122_v5 = vpop.permute.xlu0 %1121  ;;  %v3018_v17 = vsel %vm1396_vm8, %v1387_v9, %v1130_v45  ;;  %v836_v9 = vrot.slane %v835_v3, 4  ;;  %v3034_v45 = vpack.c.b16 %v1105_v44, %v1104_v52 }
 0x134   : > { %v3022_v20 = vsel %vm1396_vm8, %v2846_v32, %v1122_v5 }
 0x135   : > { %v841_v5 = vsel %vm2213_vm2, %v836_v9, %v840_v19  ;;  %v857_v19 = vrot.slane %v2992_v1, 5  ;;  %v1939_v9 = vrot.slane %v2990_v2, 9  ;;  %v1414_v1 = vsel %vm1396_vm8, %v2929_v53, %v2994_v8  ;;  %v3441_v2 = vld [vmem:[#allocation25_spill] sm:$0xff] }
 0x136   : > { %v1139_v3 = vunpack.c.l.b16 %v841_v5 }
 0x137   : > { %1197 = vrot.lane.b32.xlu2 %v2703_v16, %s2099_s5  ;;  %v858_v5 = vsel %vm2502_vm5, %v1939_v9, %v857_v19 }
 0x138   : > { %1170 = vrot.lane.b32.xlu1 %v2583_v33, %s2100_s6  ;;  %v851_v33 = vsel %vm2213_vm2, %v846_v23, %v850_v49  ;;  %v859_v23 = vrot.slane %v857_v19, 4  ;;  %v860_v49 = vrot.slane %v274_v57, 5  ;;  %v1174_v53 = vunpack.c.l.b16 %v858_v5  ;;  %v3443_v5 = vld [vmem:[#allocation8_spill] sm:$0xff] }
 0x139   : > { %1284 = vrot.lane.b32.xlu0 %v2579_v11, %s2102_s8  ;;  %v3032_v32 = vpop.permute.xlu2 %1150  ;;  %v1140_v56 = vunpack.c.l.b16 %v851_v33 }
 0x13a   : > { %v1167_v10 = vpop.permute.xlu1 %1166  ;;  %v861_v33 = vsel %vm2502_vm5, %v859_v23, %v860_v49 }
 0x13b   : > { %v1128_v26 = vpop.permute.xlu0 %1127  ;;  %v3052_v44 = vpack.c.b16 %v1140_v56, %v1139_v3  ;;  %v1175_v8 = vunpack.c.l.b16 %v861_v33 }
 0x13c   : > { %v3038_v16 = vsel %vm1396_vm8, %v2857_v30, %v1128_v26 }
 0x13d   : > { %v3089_v23 = vpack.c.b16 %v1175_v8, %v1174_v53  ;;  %v223_v8 = vld [vmem:[%s2178_s28 + $0x1a8] sm:$0x3] }
 0x13f   : > { %1240 = vrot.lane.b32.xlu2 %v3034_v45, %s2101_s7 }
 0x140   : > { %1232 = vrot.lane.b32.xlu1 %v2730_v47, %s2101_s7 }
 0x141   : > { %1162 = vrot.lane.b32.xlu0 %v3438_v6, %s2100_s6  ;;  %v3050_v29 = vpop.permute.xlu2 %1212 }
 0x142   : > { %v1229_v30 = vpop.permute.xlu1 %1228 }
 0x143   : > { %v1159_v52 = vpop.permute.xlu0 %1158 }
 0x147   : > { %1302 = vrot.lane.b32.xlu2 %v2676_v13, %s2102_s8 }
 0x148   : > { %1275 = vrot.lane.b32.xlu1 %v3052_v44, %s2103_s9 }
 0x149   : > { %1205 = vrot.lane.b32.xlu0 %v2699_v62, %s2099_s5  ;;  %v3061_v47 = vpop.permute.xlu2 %1255  ;;  %v1447_v62 = vsel %vm1429_vm10, %v1414_v1, %v1159_v52  ;;  %v222_v1 = vld [vmem:[%s2178_s28 + $0x1a0] sm:$0xff] }
 0x14a   : > { %v1272_v6 = vpop.permute.xlu1 %1271  ;;  %v1480_v3 = vsel %vm1462_vm11, %v1447_v62, %v2968_v7 }
 0x14b   : > { %v1202_v26 = vpop.permute.xlu0 %1201  ;;  %v1513_v52 = vsel %vm1495_vm12, %v1480_v3, %v1229_v30 }
 0x14f   : > { %1154 = vrot.lane.b32.xlu2 %v3439_v59, %s2100_s6 }
 0x150   : > { %1146 = vrot.lane.b32.xlu1 %v3440_v55, %s2100_s6  ;;  %v1422_v55 = vsel %vm1396_vm8, %v2926_v43, %v2953_v21 }
 0x151   : > { %1267 = vrot.lane.b32.xlu0 %v3441_v2, %s2103_s9  ;;  %v3078_v57 = vpop.permute.xlu2 %1133  ;;  %v1455_v7 = vsel %vm1429_vm10, %v1422_v55, %v1167_v10  ;;  %v277_v55 = vpack.c.bf16 %v223_v8, %v223_v8 }
 0x152   : > { %v1143_v56 = vpop.permute.xlu1 %1142  ;;  %v1488_v30 = vsel %vm1462_vm11, %v1455_v7, %v1202_v26 }
 0x153   : > { %v1264_v59 = vpop.permute.xlu0 %1263  ;;  %v1521_v21 = vsel %vm1495_vm12, %v1488_v30, %v2988_v28  ;;  %v882_v8 = vshll.u32 %v277_v55, 16 }
 0x154   : > { %v1546_v19 = vsel %vm1528_vm13, %v1513_v52, %v1264_v59  ;;  %v1554_v10 = vsel %vm1528_vm13, %v1521_v21, %v1272_v6  ;;  %v3119_v6 = vpack.c.bf16 %v222_v1, %v222_v1 }
 0x155   : > { %v1579_v9 = vsel %vm1561_vm14, %v1546_v19, %v3012_v46 }
 0x156   : > { %1957 = vmatmul.msk.bf16.vlgmr.msra.gmra.mxu2 %vm1614_vm15, %v1579_v9  ;;  %v872_v59 = vshll.u32 %v3119_v6, 16  ;;  %v876_v19 = vshrl.u32 %v3119_v6, 16 }
 0x157   : > { %1216 = vrot.lane.b32.xlu2 %v2722_v54, %s2101_s7  ;;  %v221_v54 = vld [vmem:[%s2178_s28 + $0x198] sm:$0xff]  ;;  %s1921_s28 = sshll.u32 %s161_s25, 6 }
 0x158   : > { %1189 = vrot.lane.b32.xlu1 %v2609_v39, %s2099_s5  ;;  %v3442_v39 = vld [vmem:[#allocation14_spill] sm:$0xff]  ;;  %v3117_v33 = vpack.c.bf16 %v221_v54, %v221_v54  ;;  %v874_v30 = vrot.slane %v872_v59, 5  ;;  %v878_v21 = vrot.slane %v876_v19, 4  ;;  %v1210_v59 = vunpack.c.l.b16 %v3119_v6  ;;  %s3304_s29 = scalar_lea.vmem [#allocation3], %s1921_s28 }
 0x159   : > { %1310 = vrot.lane.b32.xlu0 %v3089_v23, %s2102_s8  ;;  %v3100_v43 = vpop.permute.xlu2 %1195 }
 0x15a   : > { %v1186_v46 = vpop.permute.xlu1 %1185  ;;  %v863_v3 = vshrl.u32 %v3117_v33, 16  ;;  %v866_v52 = vshll.u32 %v3117_v33, 16 }
 0x15b   : > { %v1307_v49 = vpop.permute.xlu0 %1306 }
 0x15c   : > { %v1587_v26 = vsel %vm1561_vm14, %v1554_v10, %v1307_v49  ;;  %v865_v9 = vrot.slane %v863_v3, 4  ;;  %v868_v7 = vrot.slane %v866_v52, 5  ;;  %v1431_v3 = vsel %vm1429_vm10, %v2890_v36, %v1143_v56 }
 0x15d   : > { %1961 = vmatmul.msk.bf16.vlgmr.msra.gmra.mxu3 %vm1614_vm15, %v1587_v26  ;;  %v884_v56 = vrot.slane %v882_v8, 5 }
 0x15e   : > { %v869_v1 = vor.u32 %v868_v7, %v865_v9 }
 0x15f   : > { %1259 = vrot.lane.b32.xlu2 %v3442_v39, %s2103_s9 }
 0x160   : > { %1251 = vrot.lane.b32.xlu1 %v3443_v5, %s2103_s9  ;;  %v870_v36 = vrot.slane %v869_v1, 4  ;;  %v894_v1 = vrot.slane %v277_v55, 5 }
 0x161   : > { %1181 = vrot.lane.b32.xlu0 %v2579_v11, %s2099_s5  ;;  %v3115_v28 = vpop.permute.xlu2 %1238  ;;  %v1406_v11 = vsel %vm1396_vm8, %v2833_v25, %v2996_v63 }
 0x162   : > { %v1248_v62 = vpop.permute.xlu1 %1247  ;;  %v1439_v10 = vsel %vm1429_vm10, %v1406_v11, %v3032_v32 }
 0x163   : > { %v1178_v53 = vpop.permute.xlu0 %1177  ;;  %v1472_v26 = vsel %vm1462_vm11, %v1439_v10, %v1186_v46  ;;  %v1209_v46 = vunpack.c.l.b16 %v3117_v33 }
 0x164   : > { %v1464_v32 = vsel %vm1462_vm11, %v1431_v3, %v1178_v53 }
 0x165   : > { %v1497_v53 = vsel %vm1495_vm12, %v1464_v32, %v3050_v29  ;;  %v1211_v9 = vpack.c.b16 %v1210_v59, %v1209_v46 }
 0x166   : > { %v1530_v11 = vsel %vm1528_vm13, %v1497_v53, %v1248_v62 }
 0x167   : > { %1137 = vrot.lane.b32.xlu2 %v3034_v45, %s2098_s4  ;;  %s1972_s4 = sshll.u32 %s2146_s16, 6  ;;  %s1840_s16 = scalar_lea.sflag [#allocation4], %s161_s25 }
 0x168   : > { %1294 = vrot.lane.b32.xlu1 %v2678_v14, %s2102_s8 }
 0x169   : > { %1224 = vrot.lane.b32.xlu0 %v2786_v42, %s2101_s7  ;;  %v3137_v49 = vpop.permute.xlu2 %1300  ;;  %v879_v42 = vor.u32 %v878_v21, %v874_v30 }
 0x16a   : > { %v1291_v45 = vpop.permute.xlu1 %1290 }
 0x16b   : > { %v1221_v25 = vpop.permute.xlu0 %1220 }
 0x16c   : > { %v1505_v63 = vsel %vm1495_vm12, %v1472_v26, %v1221_v25 }
 0x16d   : > { %v1538_v54 = vsel %vm1528_vm13, %v1505_v63, %v3061_v47  ;;  %v880_v47 = vrot.slane %v879_v42, 4 }
 0x16e   : > { %v1571_v52 = vsel %vm1561_vm14, %v1538_v54, %v1291_v45  ;;  %v891_v54 = vrot.slane %v3119_v6, 5 }
 0x16f   : > { %1953 = vmatmul.msk.bf16.vlgmr.msra.gmra.mxu1 %vm1614_vm15, %v1571_v52  ;;  %1199 = vrot.lane.b32.xlu2 %v2676_v13, %s2099_s5  ;;  %v885_v10 = vsel %vm2213_vm2, %v880_v47, %v884_v56 }
 0x170   : > { %1172 = vrot.lane.b32.xlu1 %v3052_v44, %s2100_s6  ;;  %v875_v44 = vsel %vm2213_vm2, %v870_v36, %v874_v30  ;;  %v1245_v62 = vunpack.c.l.b16 %v885_v10  ;;  %v893_v30 = vrot.slane %v891_v54, 4 }
 0x171   : > { %1286 = vrot.lane.b32.xlu0 %v2573_v24, %s2102_s8  ;;  %v1153_v21 = vpop.permute.xlu2 %1152  ;;  %v1244_v29 = vunpack.c.l.b16 %v875_v44 }
 0x172   : > { %v1169_v19 = vpop.permute.xlu1 %1168  ;;  %v895_v6 = vsel %vm2502_vm5, %v893_v30, %v894_v1  ;;  %v1441_v47 = vsel %vm1429_vm10, %v2971_v4, %v1153_v21 }
 0x173   : > { %v1283_v13 = vpop.permute.xlu0 %1282  ;;  %v1246_v25 = vpack.c.b16 %v1245_v62, %v1244_v29 }
 0x174   : > { %v1563_v7 = vsel %vm1561_vm14, %v1530_v11, %v1283_v13 }
 0x175   : > { %1949 = vmatmul.msk.bf16.vlgmr.msra.gmra.mxu0 %vm1614_vm15, %v1563_v7 }
 0x177   : > { %1242 = vrot.lane.b32.xlu2 %v1211_v9, %s2101_s7 }
 0x178   : > { %1234 = vrot.lane.b32.xlu1 %v2724_v51, %s2101_s7  ;;  %v1940_v51 = vrot.slane %v3117_v33, 9  ;;  %v1280_v33 = vunpack.c.l.b16 %v895_v6 }
 0x179   : > { %1164 = vrot.lane.b32.xlu0 %v3441_v2, %s2100_s6  ;;  %v1215_v63 = vpop.permute.xlu2 %1214 }
 0x17a   : > { %v1231_v45 = vpop.permute.xlu1 %1230  ;;  %v892_v42 = vsel %vm2502_vm5, %v1940_v51, %v891_v54 }
 0x17b   : > { %v1161_v26 = vpop.permute.xlu0 %1160 }
 0x17f   : > { %1304 = vrot.lane.b32.xlu2 %v2672_v18, %s2102_s8  ;;  %v1449_v18 = vsel %vm1429_vm10, %v2938_v40, %v1161_v26 }
 0x180   : > { %1277 = vrot.lane.b32.xlu1 %v1246_v25, %s2103_s9  ;;  %v1482_v55 = vsel %vm1462_vm11, %v1449_v18, %v3100_v43 }
 0x181   : > { %1207 = vrot.lane.b32.xlu0 %v3089_v23, %s2099_s5  ;;  %v1258_v8 = vpop.permute.xlu2 %1257  ;;  %v1279_v23 = vunpack.c.l.b16 %v892_v42  ;;  %v1515_v3 = vsel %vm1495_vm12, %v1482_v55, %v1231_v45 }
 0x182   : > { %v1274_v35 = vpop.permute.xlu1 %1273 }
 0x183   : > { %v1204_v2 = vpop.permute.xlu0 %1203  ;;  %v1281_v32 = vpack.c.b16 %v1280_v33, %v1279_v23 }
 0x187   : > { %1156 = vrot.lane.b32.xlu2 %v3442_v39, %s2100_s6  ;;  %v1424_v39 = vsel %vm1396_vm8, %v2876_v31, %v3078_v57 }
 0x188   : > { %1148 = vrot.lane.b32.xlu1 %v3443_v5, %s2100_s6 }
 0x189   : > { %1269 = vrot.lane.b32.xlu0 %v2511_v15, %s2103_s9  ;;  %v1457_v15 = vsel %vm1429_vm10, %v1424_v39, %v1169_v19  ;;  %v1136_v57 = vpop.permute.xlu2 %1135 }
 0x18a   : > { %v1145_v58 = vpop.permute.xlu1 %1144  ;;  %v1490_v43 = vsel %vm1462_vm11, %v1457_v15, %v1204_v2  ;;  %v1426_v30 = vsel %vm1396_vm8, %v2960_v27, %v1136_v57 }
 0x18b   : > { %v1266_v52 = vpop.permute.xlu0 %1265  ;;  %v1523_v31 = vsel %vm1495_vm12, %v1490_v43, %v3115_v28  ;;  %v1433_v19 = vsel %vm1429_vm10, %v2975_v61, %v1145_v58 }
 0x18c   : > { %v1548_v40 = vsel %vm1528_vm13, %v1515_v3, %v1266_v52  ;;  %v1556_v46 = vsel %vm1528_vm13, %v1523_v31, %v1274_v35 }
 0x18d   : > { %v1581_v5 = vsel %vm1561_vm14, %v1548_v40, %v3137_v49 }
 0x18e   : > { %1958 = vmatmul.msk.bf16.gmra.mxu2 %vm1614_vm15, %v1581_v5 }
 0x18f   : > { %1218 = vrot.lane.b32.xlu2 %v2774_v50, %s2101_s7 }
 0x190   : > { %1191 = vrot.lane.b32.xlu1 %v2678_v14, %s2099_s5 }
 0x191   : > { %1312 = vrot.lane.b32.xlu0 %v1281_v32, %s2102_s8  ;;  %v1198_v28 = vpop.permute.xlu2 %1197 }
 0x192   : > { %v1188_v49 = vpop.permute.xlu1 %1187 }
 0x193   : > { %v1309_v59 = vpop.permute.xlu0 %1308 }
 0x194   : > { %v1589_v36 = vsel %vm1561_vm14, %v1556_v46, %v1309_v59 }
 0x195   : > { %1962 = vmatmul.msk.bf16.gmra.mxu3 %vm1614_vm15, %v1589_v36 }
 0x197   : > { %1261 = vrot.lane.b32.xlu2 %v3428_v0, %s2103_s9  ;;  %v1474_v0 = vsel %vm1462_vm11, %v1441_v47, %v1188_v49 }
 0x198   : > { %1253 = vrot.lane.b32.xlu1 %v3430_v37, %s2103_s9 }
 0x199   : > { %1183 = vrot.lane.b32.xlu0 %v2573_v24, %s2099_s5  ;;  %v1241_v11 = vpop.permute.xlu2 %1240 }
 0x19a   : > { %v1250_v14 = vpop.permute.xlu1 %1249 }
 0x19b   : > { %v1180_v50 = vpop.permute.xlu0 %1179 }
 0x19c   : > { %v1466_v13 = vsel %vm1462_vm11, %v1433_v19, %v1180_v50 }
 0x1a0   : > { %1296 = vrot.lane.b32.xlu1 %v2649_v22, %s2102_s8 }
 0x1a1   : > { %1226 = vrot.lane.b32.xlu0 %v2772_v41, %s2101_s7  ;;  %v1499_v41 = vsel %vm1495_vm12, %v1466_v13, %v1215_v63  ;;  %v1303_v61 = vpop.permute.xlu2 %1302  ;;  %s1851_s7 = scalar_lea.hbm %s3359_s3, %s1972_s4 }
 0x1a2   : > { %v1293_v56 = vpop.permute.xlu1 %1292  ;;  %v1532_v9 = vsel %vm1528_vm13, %v1499_v41, %v1250_v14  ;;  %s1854_s9 = sshll.u32 %s1851_s7, 4  ;;  %s1855_s9 = int_to_ptr.hbm [resolvable:$true] %s1854_s9 }
 0x1a3   : > { %v1223_v53 = vpop.permute.xlu0 %1222  ;;  %s2046_s10 = sshra.s32 %s1855_s9, 4  ;;  %s2047_s10 = int_to_ptr.hbm [resolvable:$true] %s2046_s10 }
 0x1a4   : > { %v1507_v37 = vsel %vm1495_vm12, %v1474_v0, %v1223_v53  ;;  %s2048_s11 = scalar_lea.hbm %s2047_s10, 64  ;;  %p2053_p0 = scmp.lt.s32.totalorder %s2047_s10, %s3359_s3 }
 0x1a5   : > { %v1540_v24 = vsel %vm1528_vm13, %v1507_v37, %v1258_v8  ;;  %p2049_p11 = scmp.ne.s32.totalorder %s2047_s10, %s2048_s11  ;;  %p2054_p1 = scmp.lt.s32.totalorder %s2052_s20, %s2048_s11 }
 0x1a6   : > { %v1573_v22 = vsel %vm1561_vm14, %v1540_v24, %v1293_v56 }
 0x1a7   : > { %1954 = vmatmul.msk.bf16.gmra.mxu1 %vm1614_vm15, %v1573_v22  ;;  %p2050_p12 = pnand %p2049_p11, %p2163_p5  ;;  %p2055_p2 = por %p2054_p1, %p2053_p0 }
 0x1a9   : > { %1288 = vrot.lane.b32.xlu0 %v2644_v12, %s2102_s8  ;;  %v1155_v29 = vpop.permute.xlu2 %1154  ;;  %s1852_s8 = sshll.u32 %s3304_s29, 4  ;;  %p2051_p13 = pneg %p2050_p12  ;;  %s1853_s8 = int_to_ptr.vmem [resolvable:$true] %s1852_s8 }
 0x1aa   : > { %v1171_v4 = vpop.permute.xlu1 %1170  ;;  %v1443_v3 = vsel %vm1429_vm10, %v2920_v34, %v1155_v29 }
 0x1ab   : > { %v1285_v7 = vpop.permute.xlu0 %1284  ;;  %v1459_v2 = vsel %vm1429_vm10, %v1426_v30, %v1171_v4  ;;  %p2056_p3 = pnand %p2055_p2, %p2051_p13 }
 0x1ac   : > { %v1565_v21 = vsel %vm1561_vm14, %v1532_v9, %v1285_v7 }
 0x1ad   : > { %1950 = vmatmul.msk.bf16.gmra.mxu0 %vm1614_vm15, %v1565_v21 }
 0x1b1   : > { %v1217_v35 = vpop.permute.xlu2 %1216 }
 0x1b2   : > { %v1233_v44 = vpop.permute.xlu1 %1232 }
 0x1b3   : > { %v1163_v10 = vpop.permute.xlu0 %1162 }
 0x1b4   : > { %v1451_v26 = vsel %vm1429_vm10, %v3038_v16, %v1163_v10 }
 0x1b5   : > { %v1484_v12 = vsel %vm1462_vm11, %v1451_v26, %v1198_v28 }
 0x1b6   : > { %v1517_v63 = vsel %vm1495_vm12, %v1484_v12, %v1233_v44 }
 0x1b9   : > { %v1260_v33 = vpop.permute.xlu2 %1259 }
 0x1ba   : > { %v1276_v62 = vpop.permute.xlu1 %1275 }
 0x1bb   : > { %v1206_v45 = vpop.permute.xlu0 %1205 }
 0x1bc   : > { %v1492_v16 = vsel %vm1462_vm11, %v1459_v2, %v1206_v45 }
 0x1bd   : > { %v1525_v42 = vsel %vm1495_vm12, %v1492_v16, %v1241_v11 }
 0x1be   : > { %v1558_v18 = vsel %vm1528_vm13, %v1525_v42, %v1276_v62 }
 0x1c1   : > { %v1138_v58 = vpop.permute.xlu2 %1137 }
 0x1c2   : > { %v1147_v25 = vpop.permute.xlu1 %1146  ;;  %v1428_v22 = vsel %vm1396_vm8, %v2944_v38, %v1138_v58 }
 0x1c3   : > { %v1268_v54 = vpop.permute.xlu0 %1267  ;;  %v1435_v15 = vsel %vm1429_vm10, %v2956_v48, %v1147_v25 }
 0x1c4   : > { %v1550_v51 = vsel %vm1528_vm13, %v1517_v63, %v1268_v54 }
 0x1c5   : > { %v1583_v1 = vsel %vm1561_vm14, %v1550_v51, %v1303_v61 }
 0x1c6   : > { %1959 = vmatmul.msk.bf16.gmra.mxu2 %vm1614_vm15, %v1583_v1 }
 0x1c9   : > { %v1200_v57 = vpop.permute.xlu2 %1199 }
 0x1ca   : > { %v1190_v6 = vpop.permute.xlu1 %1189 }
 0x1cb   : > { %v1311_v8 = vpop.permute.xlu0 %1310  ;;  %v1476_v40 = vsel %vm1462_vm11, %v1443_v3, %v1190_v6 }
 0x1cc   : > { %v1591_v23 = vsel %vm1561_vm14, %v1558_v18, %v1311_v8 }
 0x1cd   : > { %1963 = vmatmul.msk.bf16.gmra.mxu3 %vm1614_vm15, %v1591_v23 }
 0x1d1   : > { %v1243_v48 = vpop.permute.xlu2 %1242 }
 0x1d2   : > { %v1252_v27 = vpop.permute.xlu1 %1251 }
 0x1d3   : > { %v1182_v55 = vpop.permute.xlu0 %1181 }
 0x1d4   : > { %v1468_v31 = vsel %vm1462_vm11, %v1435_v15, %v1182_v55  ;;  %v3299_v15 = vld [vmem:[%s3358_s2] ss:$0 sm:$0xff] }
 0x1d5   : > { %v1501_v34 = vsel %vm1495_vm12, %v1468_v31, %v1217_v35 }
 0x1d6   : > { %v1534_v46 = vsel %vm1528_vm13, %v1501_v34, %v1252_v27 }
 0x1d9   : > { %v1305_v56 = vpop.permute.xlu2 %1304  ;;  %v1700_v4 = vpop.f32.mrf.mxu2 }
 0x1da   : > { %v1295_v52 = vpop.permute.xlu1 %1294 }
 0x1db   : > { %v1225_v39 = vpop.permute.xlu0 %1224 }
 0x1dc   : > { %v1509_v5 = vsel %vm1495_vm12, %v1476_v40, %v1225_v39 }
 0x1dd   : > { %v1542_v32 = vsel %vm1528_vm13, %v1509_v5, %v1260_v33 }
 0x1de   : > { %v1575_v43 = vsel %vm1561_vm14, %v1542_v32, %v1295_v52 }
 0x1df   : > { %1955 = vmatmul.msk.bf16.gmra.mxu1 %vm1614_vm15, %v1575_v43 }
 0x1e0   : > { %v1720_v38 = vpop.f32.mrf.mxu3 }
 0x1e1   : > { %v1157_v9 = vpop.permute.xlu2 %1156  ;;  %v1702_v62 = vpop.f32.mrf.mxu2 }
 0x1e2   : > { %v1173_v49 = vpop.permute.xlu1 %1172  ;;  %v1445_v63 = vsel %vm1429_vm10, %v3022_v20, %v1157_v9 }
 0x1e3   : > { %v1287_v59 = vpop.permute.xlu0 %1286  ;;  %v1461_v41 = vsel %vm1429_vm10, %v1428_v22, %v1173_v49 }
 0x1e4   : > { %v1567_v36 = vsel %vm1561_vm14, %v1534_v46, %v1287_v59 }
 0x1e5   : > { %1951 = vmatmul.msk.bf16.gmra.mxu0 %vm1614_vm15, %v1567_v36 }
 0x1e8   : > { %v1722_v12 = vpop.f32.mrf.mxu3 }
 0x1e9   : > { %v1219_v29 = vpop.permute.xlu2 %1218 }
 0x1ea   : > { %v1235_v14 = vpop.permute.xlu1 %1234 }
 0x1eb   : > { %v1165_v50 = vpop.permute.xlu0 %1164 }
 0x1ec   : > { %v1453_v0 = vsel %vm1429_vm10, %v3018_v17, %v1165_v50  ;;  %v1680_v54 = vpop.f32.mrf.mxu1 }
 0x1ed   : > { %v1486_v53 = vsel %vm1462_vm11, %v1453_v0, %v1200_v57 }
 0x1ee   : > { %v1519_v24 = vsel %vm1495_vm12, %v1486_v53, %v1235_v14 }
 0x1f1   : > { %v1262_v51 = vpop.permute.xlu2 %1261 }
 0x1f2   : > { %v1278_v28 = vpop.permute.xlu1 %1277  ;;  %v1660_v20 = vpop.f32.mrf.mxu0 }
 0x1f3   : > { %v1208_v47 = vpop.permute.xlu0 %1207 }
 0x1f4   : > { %v1494_v17 = vsel %vm1462_vm11, %v1461_v41, %v1208_v47 }
 0x1f5   : > { %v1527_v7 = vsel %vm1495_vm12, %v1494_v17, %v1243_v48 }
 0x1f6   : > { %v1560_v61 = vsel %vm1528_vm13, %v1527_v7, %v1278_v28 }
 0x1fa   : > { %v1149_v37 = vpop.permute.xlu1 %1148  ;;  %v1662_v32 = vpop.f32.mrf.mxu0 }
 0x1fb   : > { %v1270_v19 = vpop.permute.xlu0 %1269  ;;  %v1437_v6 = vsel %vm1429_vm10, %v2904_v60, %v1149_v37  ;;  %v1682_v60 = vpop.f32.mrf.mxu1 }
 0x1fc   : > { %v1552_v11 = vsel %vm1528_vm13, %v1519_v24, %v1270_v19 }
 0x1fd   : > { %v1585_v13 = vsel %vm1561_vm14, %v1552_v11, %v1305_v56 }
 0x1fe   : > { %1960 = vmatmul.msk.bf16.gmra.mxu2 %vm1614_vm15, %v1585_v13 }
 0x202   : > { %v1192_v21 = vpop.permute.xlu1 %1191 }
 0x203   : > { %v1313_v44 = vpop.permute.xlu0 %1312  ;;  %v1478_v30 = vsel %vm1462_vm11, %v1445_v63, %v1192_v21 }
 0x204   : > { %v1593_v10 = vsel %vm1561_vm14, %v1560_v61, %v1313_v44 }
 0x205   : > { %1964 = vmatmul.msk.bf16.gmra.mxu3 %vm1614_vm15, %v1593_v10 }
 0x20a   : > { %v1254_v45 = vpop.permute.xlu1 %1253 }
 0x20b   : > { %v1184_v26 = vpop.permute.xlu0 %1183 }
 0x20c   : > { %v1470_v8 = vsel %vm1462_vm11, %v1437_v6, %v1184_v26 }
 0x20d   : > { %v1503_v55 = vsel %vm1495_vm12, %v1470_v8, %v1219_v29 }
 0x20e   : > { %v1536_v3 = vsel %vm1528_vm13, %v1503_v55, %v1254_v45 }
 0x211   : > { %v1705_v25 = vpop.f32.mrf.mxu2 }
 0x212   : > { %v1748_v35 = vmax.f32 %v1700_v4, %v1705_v25  ;;  %v1297_v2 = vpop.permute.xlu1 %1296 }
 0x213   : > { %v1227_v1 = vpop.permute.xlu0 %1226 }
 0x214   : > { %1764 = vst [vmem:[#allocation2 + $0x40] sm:$0xff] %v1748_v35  ;;  %v1511_v16 = vsel %vm1495_vm12, %v1478_v30, %v1227_v1 }
 0x215   : > { %v1544_v42 = vsel %vm1528_vm13, %v1511_v16, %v1262_v51 }
 0x216   : > { %v1577_v18 = vsel %vm1561_vm14, %v1544_v42, %v1297_v2 }
 0x217   : > { %1956 = vmatmul.msk.bf16.gmra.mxu1 %vm1614_vm15, %v1577_v18 }
 0x218   : > { %v1725_v23 = vpop.f32.mrf.mxu3 }
 0x219   : > { %v1752_v33 = vmax.f32 %v1720_v38, %v1725_v23  ;;  %v1707_v27 = vpop.f32.mrf.mxu2 }
 0x21a   : > { %v1749_v58 = vmax.f32 %v1702_v62, %v1707_v27 }
 0x21b   : > { %1768 = vst [vmem:[#allocation2 + $0x60] sm:$0xff] %v1752_v33  ;;  %v1289_v52 = vpop.permute.xlu0 %1288 }
 0x21c   : > { %1765 = vst [vmem:[#allocation2 + $0x48] sm:$0xff] %v1749_v58  ;;  %v1569_v40 = vsel %vm1561_vm14, %v1536_v3, %v1289_v52 }
 0x21d   : > { %1952 = vmatmul.msk.bf16.gmra.mxu0 %vm1614_vm15, %v1569_v40 }
 0x220   : > { %v1727_v39 = vpop.f32.mrf.mxu3 }
 0x221   : > { %v1753_v5 = vmax.f32 %v1722_v12, %v1727_v39 }
 0x223   : > { %v1780_v43 = vld [vmem:[#allocation2 + $0x40] ss:$2 sm:$0xff]  ;;  %v1796_v31 = vld [vmem:[#allocation2 + $0x41] ss:$2 sm:$0xff]  ;;  %1769 = vst [vmem:[#allocation2 + $0x68] sm:$0xff] %v1753_v5 }
 0x224   : > { %v1807_v57 = vmax.f32 %v1780_v43, %v1796_v31  ;;  %v1685_v34 = vpop.f32.mrf.mxu1 }
 0x225   : > { %v1744_v49 = vmax.f32 %v1680_v54, %v1685_v34 }
 0x226   : > { %v1819_v46 = vadd.f32 %v3299_v15, %v1807_v57 }
 0x227   : > { %1760 = vst [vmem:[#allocation2 + $0x20] sm:$0xff] %v1744_v49 }
 0x228   : > { %v1827_v59 = vmax.f32 %v1819_v46, 0.0 }
 0x22a   : > { %1835 = vst [vmem:[%s3304_s29 + $0x20] sm:$0xff] %v1827_v59  ;;  %v1784_v36 = vld [vmem:[#allocation2 + $0x60] ss:$2 sm:$0xff]  ;;  %v1800_v14 = vld [vmem:[#allocation2 + $0x61] ss:$2 sm:$0xff]  ;;  %v1665_v50 = vpop.f32.mrf.mxu0 }
 0x22b   : > { %v1809_v48 = vmax.f32 %v1784_v36, %v1800_v14  ;;  %v1740_v28 = vmax.f32 %v1660_v20, %v1665_v50 }
 0x22c   : > { %v1687_v47 = vpop.f32.mrf.mxu1 }
 0x22d   : > { %v1821_v56 = vadd.f32 %v3299_v15, %v1809_v48  ;;  %1756 = vst [vmem:[#allocation2] sm:$0xff] %v1740_v28  ;;  %v1745_v0 = vmax.f32 %v1682_v60, %v1687_v47 }
 0x22f   : > { %v1829_v53 = vmax.f32 %v1821_v56, 0.0  ;;  %1761 = vst [vmem:[#allocation2 + $0x28] sm:$0xff] %v1745_v0 }
 0x231   : > { %1837 = vst [vmem:[%s3304_s29 + $0x30] sm:$0xff] %v1829_v53 }
 0x232   : > { %v1667_v37 = vpop.f32.mrf.mxu0 }
 0x233   : > { %v1741_v24 = vmax.f32 %v1662_v32, %v1667_v37 }
 0x235   : > { %1757 = vst [vmem:[#allocation2 + $0x8] sm:$0xff] %v1741_v24 }
 0x236   : > { %v1776_v19 = vld [vmem:[#allocation2 + $0x20] ss:$2 sm:$0xff]  ;;  %v1792_v11 = vld [vmem:[#allocation2 + $0x21] ss:$2 sm:$0xff] }
 0x237   : > { %v1805_v22 = vmax.f32 %v1776_v19, %v1792_v11 }
 0x239   : > { %v1817_v13 = vadd.f32 %v3299_v15, %v1805_v22 }
 0x23b   : > { %v1825_v41 = vmax.f32 %v1817_v13, 0.0 }
 0x23c   : > { %v1772_v4 = vld [vmem:[#allocation2] ss:$2 sm:$0xff]  ;;  %v1788_v17 = vld [vmem:[#allocation2 + $0x1] ss:$2 sm:$0xff] }
 0x23d   : > { %v1803_v9 = vmax.f32 %v1772_v4, %v1788_v17  ;;  %1833 = vst [vmem:[%s3304_s29 + $0x10] sm:$0xff] %v1825_v41 }
 0x23f   : > { %v1815_v7 = vadd.f32 %v3299_v15, %v1803_v9 }
 0x241   : > { %v1823_v21 = vmax.f32 %v1815_v7, 0.0 }
 0x243   : > { %1831 = vst [vmem:[%s3304_s29] sm:$0xff] %v1823_v21 }
 0x249   : > { %v1710_v61 = vpop.f32.mrf.mxu2 }
 0x250   : > { %v1730_v44 = vpop.f32.mrf.mxu3 }
 0x251   : > { %v1712_v10 = vpop.f32.mrf.mxu2 }
 0x258   : > { %v1732_v38 = vpop.f32.mrf.mxu3 }
 0x25c   : > { %v1690_v62 = vpop.f32.mrf.mxu1 }
 0x262   : > { %v1670_v26 = vpop.f32.mrf.mxu0 }
 0x264   : > { %v1692_v35 = vpop.f32.mrf.mxu1 }
 0x26a   : > { %v1672_v1 = vpop.f32.mrf.mxu0 }
 0x281   : > { %v1715_v29 = vpop.f32.mrf.mxu2 }
 0x282   : > { %v1750_v45 = vmax.f32 %v1710_v61, %v1715_v29 }
 0x284   : > { %1766 = vst [vmem:[#allocation2 + $0x50] sm:$0xff] %v1750_v45 }
 0x288   : > { %v1735_v12 = vpop.f32.mrf.mxu3 }
 0x289   : > { %v1754_v25 = vmax.f32 %v1730_v44, %v1735_v12  ;;  %v1717_v63 = vpop.f32.mrf.mxu2 }
 0x28a   : > { %v1751_v54 = vmax.f32 %v1712_v10, %v1717_v63 }
 0x28b   : > { %1770 = vst [vmem:[#allocation2 + $0x70] sm:$0xff] %v1754_v25 }
 0x28c   : > { %1767 = vst [vmem:[#allocation2 + $0x58] sm:$0xff] %v1751_v54 }
 0x290   : > { %v1737_v51 = vpop.f32.mrf.mxu3 }
 0x291   : > { %v1755_v30 = vmax.f32 %v1732_v38, %v1737_v51 }
 0x293   : > { %v1782_v2 = vld [vmem:[#allocation2 + $0x50] ss:$2 sm:$0xff]  ;;  %v1798_v16 = vld [vmem:[#allocation2 + $0x51] ss:$2 sm:$0xff]  ;;  %1771 = vst [vmem:[#allocation2 + $0x78] sm:$0xff] %v1755_v30 }
 0x294   : > { %v1808_v42 = vmax.f32 %v1782_v2, %v1798_v16  ;;  %v1695_v6 = vpop.f32.mrf.mxu1 }
 0x295   : > { %v1746_v18 = vmax.f32 %v1690_v62, %v1695_v6 }
 0x296   : > { %v1820_v8 = vadd.f32 %v3299_v15, %v1808_v42 }
 0x297   : > { %1762 = vst [vmem:[#allocation2 + $0x30] sm:$0xff] %v1746_v18 }
 0x298   : > { %v1828_v20 = vmax.f32 %v1820_v8, 0.0 }
 0x29a   : > { %1836 = vst [vmem:[%s3304_s29 + $0x28] sm:$0xff] %v1828_v20  ;;  %v1786_v23 = vld [vmem:[#allocation2 + $0x70] ss:$2 sm:$0xff]  ;;  %v1802_v33 = vld [vmem:[#allocation2 + $0x71] ss:$2 sm:$0xff]  ;;  %v1675_v27 = vpop.f32.mrf.mxu0 }
 0x29b   : > { %v1810_v55 = vmax.f32 %v1786_v23, %v1802_v33  ;;  %v1742_v58 = vmax.f32 %v1670_v26, %v1675_v27 }
 0x29c   : > { %v1697_v3 = vpop.f32.mrf.mxu1 }
 0x29d   : > { %v1822_v52 = vadd.f32 %v3299_v15, %v1810_v55  ;;  %1758 = vst [vmem:[#allocation2 + $0x10] sm:$0xff] %v1742_v58  ;;  %v1747_v60 = vmax.f32 %v1692_v35, %v1697_v3 }
 0x29f   : > { %v1830_v40 = vmax.f32 %v1822_v52, 0.0  ;;  %1763 = vst [vmem:[#allocation2 + $0x38] sm:$0xff] %v1747_v60 }
 0x2a1   : > { %1838 = vst [vmem:[%s3304_s29 + $0x38] sm:$0xff] %v1830_v40 }
 0x2a2   : > { %v1677_v39 = vpop.f32.mrf.mxu0 }
 0x2a3   : > { %v1743_v5 = vmax.f32 %v1672_v1, %v1677_v39 }
 0x2a5   : > { %1759 = vst [vmem:[#allocation2 + $0x18] sm:$0xff] %v1743_v5 }
 0x2a6   : > { %v1778_v32 = vld [vmem:[#allocation2 + $0x30] ss:$2 sm:$0xff]  ;;  %v1794_v43 = vld [vmem:[#allocation2 + $0x31] ss:$2 sm:$0xff] }
 0x2a7   : > { %v1806_v31 = vmax.f32 %v1778_v32, %v1794_v43 }
 0x2a9   : > { %v1818_v57 = vadd.f32 %v3299_v15, %v1806_v31 }
 0x2ab   : > { %v1826_v34 = vmax.f32 %v1818_v57, 0.0 }
 0x2ac   : > { %v1774_v49 = vld [vmem:[#allocation2 + $0x10] ss:$2 sm:$0xff]  ;;  %v1790_v46 = vld [vmem:[#allocation2 + $0x11] ss:$2 sm:$0xff] }
 0x2ad   : > { %v1804_v59 = vmax.f32 %v1774_v49, %v1790_v46  ;;  %1834 = vst [vmem:[%s3304_s29 + $0x18] sm:$0xff] %v1826_v34 }
 0x2af   : > { %v1816_v36 = vadd.f32 %v3299_v15, %v1804_v59 }
 0x2b1   : > { %v1824_v14 = vmax.f32 %v1816_v36, 0.0 }
 0x2b3   : > { %1832 = vst [vmem:[%s3304_s29 + $0x8] sm:$0xff] %v1824_v14 }
 0x2b4   : > { %2059 = shalt.err (!%p2056_p3)
}
 0x2b5   : > { %s2104_s25 = smov 128  }
 0x2b6   : > { %1983 = dma.vmem_to_hbm [thread:$0]  (%p2163_p5), %s1853_s8, 1024, %s1855_s9, %s1840_s16, %s2104_s25, %s2104_s25, %s2097_s30  }
 0x2b7 PF: > { %p1989_p4 = scmp.ge.s32.totalorder %s2094_s15, 2  ;;  %s1869_s27 = sand.u32 1, %s2082_s12  }
 0x2b8   : > { %s1870_s28 = scalar_lea.sflag [#allocation4], %s1869_s27 }
 0x2b9   : > { %p1986_p7 = pnand %p1989_p4, %p2167_p6 }
 0x2bb   : > { %p1987_p8 = pneg %p1986_p7 }
 0x2bd   : > { %2077 = dma.done.wait (%p1987_p8), %s1870_s28, 1024  }
 0x2be   : > { %2079 = vsyncadd (%p1987_p8), %s1870_s28, 4294966272  ;;  %p13_p9 = scmp.ge.s32.totalorder %s2150_s18, 4   ;;  %s3444_s12 = smov %s2086_s13 }
 0x2bf   : > { %s3445_s13 = smov %s2090_s14  ;;  %s3446_s14 = smov %s2161_s21 }
 0x2c0   : > { %s3447_s15 = smov %s2150_s18  ;;  %15 = sbr.rel (!%p13_p9) target bundleno = 3 (0x3), region = 82 }
 0x2c5   :  { %1876 = vsyncpa [#allocation4], 1 }
 0x2c6   :  { %1878 = vsyncpa [#allocation4 + $0x1], 1 }

</bundles_post_ra>
